<compile_context>
chip_gen: v5e
topology: v5e:2x2
jax: 0.10.0
libtpu: 0.0.40
codegen_flags: <defaults>
</compile_context>

<pallas_src>
import functools

import jax
import jax.numpy as jnp
from jax.experimental import pallas as pl
from jax.experimental.pallas import tpu as pltpu


# Set to jnp.bfloat16 on v6e/v7x for 2x MXU throughput (accumulation stays f32).
MXU_DTYPE = None


def _mm(a, b):
    """MXU matmul with f32 accumulation, optional bf16 operand cast."""
    if MXU_DTYPE is not None:
        a = a.astype(MXU_DTYPE)
        b = b.astype(MXU_DTYPE)
    return jnp.dot(a, b, preferred_element_type=jnp.float32)


def _silu(x):
    return x * jax.nn.sigmoid(x)      # sigmoid -> EUP slot, mul -> VPU


def _pick_tile(m, candidates=(1024, 512, 256, 128, 64, 32, 16, 8)):
    """Largest M-tile (multiple of 8) that divides M; whole array otherwise."""
    for t in candidates:
        if t <= m and m % t == 0:
            return t
    return m


# ---------------------------------------------------------------------------
# Kernel 1: cv1 = 1x1 conv + bias + SiLU, with the channel chunk(2) fused in.
#           x:(tm,Cin) @ w:(Cin,2c) -> split into y0:(tm,c), y1:(tm,c)
# ---------------------------------------------------------------------------
def _cv1_split_kernel(x_ref, w_ref, b_ref, o0_ref, o1_ref, *, c):
    acc = _mm(x_ref[...], w_ref[...]) + b_ref[...]
    act = _silu(acc)
    o0_ref[...] = act[:, :c].astype(o0_ref.dtype)
    o1_ref[...] = act[:, c:].astype(o1_ref.dtype)


def cv1_split_silu(x_nhwc, w, b, c, *, tm=None):
    """x:(N,H,W,Cin), w:(Cin,2c), b:(2c,) -> (y0, y1) each (M, c), M=N*H*W."""
    n, h, wd, cin = x_nhwc.shape
    cout = w.shape[1]
    m = n * h * wd
    if tm is None:
        tm = _pick_tile(m)
    xm = x_nhwc.reshape(m, cin)
    return pl.pallas_call(
        functools.partial(_cv1_split_kernel, c=c),
        out_shape=(jax.ShapeDtypeStruct((m, c), x_nhwc.dtype),
                   jax.ShapeDtypeStruct((m, c), x_nhwc.dtype)),
        grid=(m // tm,),
        in_specs=[
            pl.BlockSpec((tm, cin), lambda i: (i, 0)),
            pl.BlockSpec((cin, cout), lambda i: (0, 0)),
            pl.BlockSpec((1, cout), lambda i: (0, 0)),
        ],
        out_specs=(pl.BlockSpec((tm, c), lambda i: (i, 0)),
                   pl.BlockSpec((tm, c), lambda i: (i, 0))),
        compiler_params=pltpu.CompilerParams(dimension_semantics=("parallel",)),
    )(xm, w, b.reshape(1, cout))


# ---------------------------------------------------------------------------
# Kernel 2: fused Bottleneck:  SiLU(conv3x3_b( SiLU(conv3x3_a(x)) )) [+ x]
#           Padding halo + intermediate activation stay in a VMEM scratch.
#           Weights are flattened as (9*c, c): row (di*3+dj)*c + ci, col co.
# ---------------------------------------------------------------------------
def _bottleneck_kernel(x_ref, wa_ref, ba_ref, wb_ref, bb_ref, o_ref, pad_ref, *, add):
    _, h, w, c = x_ref.shape

    # zero-fill the padded scratch once; borders stay zero for BOTH convs
    pad_ref[...] = jnp.zeros_like(pad_ref)
    pad_ref[1:h + 1, 1:w + 1, :] = x_ref[0].astype(jnp.float32)

    def conv3x3_silu(w_full, b_row):
        xp = pad_ref[...]                                # (h+2, w+2, c)
        acc = jnp.zeros((h * w, c), jnp.float32)
        for t in range(9):                               # 9 shifted slices -> MXU dots
            di, dj = t // 3, t % 3
            patch = xp[di:di + h, dj:dj + w, :].reshape(h * w, c)
            acc = acc + _mm(patch, w_full[t * c:(t + 1) * c, :])
        acc = acc + b_row
        return _silu(acc).reshape(h, w, c)

    wa = wa_ref[...]
    wb = wb_ref[...]
    t1 = conv3x3_silu(wa, ba_ref[...])
    pad_ref[1:h + 1, 1:w + 1, :] = t1                    # reuse scratch: borders still zero
    out = conv3x3_silu(wb, bb_ref[...])
    if add:
        out = out + x_ref[0].astype(jnp.float32)
    o_ref[0] = out.astype(o_ref.dtype)


def bottleneck_fused(y_nhwc, w_a, b_a, w_b, b_b, *, add):
    n, h, w, c = y_nhwc.shape
    return pl.pallas_call(
        functools.partial(_bottleneck_kernel, add=add),
        out_shape=jax.ShapeDtypeStruct((n, h, w, c), y_nhwc.dtype),
        grid=(n,),
        in_specs=[
            pl.BlockSpec((1, h, w, c), lambda b: (b, 0, 0, 0)),
            pl.BlockSpec((9 * c, c), lambda b: (0, 0)),
            pl.BlockSpec((1, c), lambda b: (0, 0)),
            pl.BlockSpec((9 * c, c), lambda b: (0, 0)),
            pl.BlockSpec((1, c), lambda b: (0, 0)),
        ],
        out_specs=pl.BlockSpec((1, h, w, c), lambda b: (b, 0, 0, 0)),
        scratch_shapes=[pltpu.VMEM((h + 2, w + 2, c), jnp.float32)],
        compiler_params=pltpu.CompilerParams(dimension_semantics=("parallel",)),
    )(y_nhwc, w_a, b_a.reshape(1, c), w_b, b_b.reshape(1, c))


# ---------------------------------------------------------------------------
# Kernel 3: cv2 = 1x1 conv + bias + SiLU over the channel concat, with the
#           concat fused away: out = SiLU( sum_i y_i @ w2[i*c:(i+1)*c] + b ).
# ---------------------------------------------------------------------------
def _cv2_fused_kernel(*refs, n_parts, c):
    y_refs = refs[:n_parts]
    w_ref, b_ref, o_ref = refs[n_parts:]
    w_full = w_ref[...]
    acc = _mm(y_refs[0][...], w_full[0:c, :])
    for i in range(1, n_parts):
        acc = acc + _mm(y_refs[i][...], w_full[i * c:(i + 1) * c, :])
    acc = acc + b_ref[...]
    o_ref[...] = _silu(acc).astype(o_ref.dtype)


def cv2_fused_silu(parts, w, b, *, tm=None):
    """parts: list of (M, c) arrays; w: ((len(parts))*c, c2); b: (c2,) -> (M, c2)."""
    m, c = parts[0].shape
    cout = w.shape[1]
    n_parts = len(parts)
    if tm is None:
        tm = _pick_tile(m)
    part_spec = pl.BlockSpec((tm, c), lambda i: (i, 0))
    return pl.pallas_call(
        functools.partial(_cv2_fused_kernel, n_parts=n_parts, c=c),
        out_shape=jax.ShapeDtypeStruct((m, cout), parts[0].dtype),
        grid=(m // tm,),
        in_specs=[part_spec] * n_parts + [
            pl.BlockSpec((n_parts * c, cout), lambda i: (0, 0)),
            pl.BlockSpec((1, cout), lambda i: (0, 0)),
        ],
        out_specs=pl.BlockSpec((tm, cout), lambda i: (i, 0)),
        compiler_params=pltpu.CompilerParams(dimension_semantics=("parallel",)),
    )(*parts, w, b.reshape(1, cout))


# ---------------------------------------------------------------------------
# Full C2f forward (wrapper glue in plain JAX: transposes / reshapes only)
# ---------------------------------------------------------------------------
def c2f_forward(x_nchw, params, n=1, shortcut=False):
    x = jnp.transpose(x_nchw, (0, 2, 3, 1))                  # NCHW -> NHWC
    nb, h, w, _ = x.shape
    c = params["w1"].shape[1] // 2
    m = nb * h * w

    y0m, y1m = cv1_split_silu(x, params["w1"], params["b1"], c)   # cv1 + chunk(2)
    ys = [y0m, y1m]
    cur = y1m.reshape(nb, h, w, c)
    for blk in params["m"]:                                  # bottleneck chain
        cur = bottleneck_fused(cur, blk["w_a"], blk["b_a"], blk["w_b"], blk["b_b"],
                               add=shortcut)
        ys.append(cur.reshape(m, c))

    out_m = cv2_fused_silu(ys, params["w2"], params["b2"])   # cv2 over fused concat
    out = out_m.reshape(nb, h, w, params["w2"].shape[1])
    return jnp.transpose(out, (0, 3, 1, 2))                  # NHWC -> NCHW


# ---------------------------------------------------------------------------
# Pure-JAX reference (for correctness check only)
# ---------------------------------------------------------------------------
def ref_forward(x_nchw, params, n=1, shortcut=False):
    x = jnp.transpose(x_nchw, (0, 2, 3, 1))

    def conv1x1(v, w, b):
        y = jnp.einsum("nhwc,cd->nhwd", v, w) + b
        return y * jax.nn.sigmoid(y)

    def conv3x3(v, wflat, b):
        cin, cout = v.shape[-1], wflat.shape[-1]
        wk = wflat.reshape(3, 3, cin, cout)
        y = jax.lax.conv_general_dilated(
            v, wk, window_strides=(1, 1), padding="SAME",
            dimension_numbers=("NHWC", "HWIO", "NHWC")) + b
        return y * jax.nn.sigmoid(y)

    y = conv1x1(x, params["w1"], params["b1"])
    c = y.shape[-1] // 2
    ys = [y[..., :c], y[..., c:]]
    cur = ys[-1]
    for blk in params["m"]:
        t = conv3x3(conv3x3(cur, blk["w_a"], blk["b_a"]), blk["w_b"], blk["b_b"])
        cur = cur + t if shortcut else t
        ys.append(cur)
    cat = jnp.concatenate(ys, axis=-1)
    out = conv1x1(cat, params["w2"], params["b2"])
    return jnp.transpose(out, (0, 3, 1, 2))


# ---------------------------------------------------------------------------
def make_params(c1, c2, n, key, e=0.5, scale=0.1):
    c = int(c2 * e)
    keys = iter(jax.random.split(key, 4 + 4 * n))

    def rnd(shape):
        return scale * jax.random.normal(next(keys), shape, jnp.float32)

    return {
        "w1": rnd((c1, 2 * c)),
        "b1": rnd((2 * c,)),
        "m": [
            {"w_a": rnd((9 * c, c)), "b_a": rnd((c,)),
             "w_b": rnd((9 * c, c)), "b_b": rnd((c,))}
            for _ in range(n)
        ],
        "w2": rnd(((2 + n) * c, c2)),
        "b2": rnd((c2,)),
    }


if __name__ == "__main__":
    key = jax.random.PRNGKey(0)
    kx, kp = jax.random.split(key)

    N, c1, H, W = 2, 4, 16, 16
    c2, n = 4, 1
    x = jax.random.normal(kx, (N, c1, H, W), jnp.float32)
    params = make_params(c1, c2, n, kp)

    out = jax.block_until_ready(c2f_forward(x, params, n=n, shortcut=False))
    ref = jax.block_until_ready(ref_forward(x, params, n=n, shortcut=False))

    assert out.shape == (N, c2, H, W), out.shape
    err = float(jnp.max(jnp.abs(out - ref)))
    assert err < 1e-3, err
    print("KERNEL_OK")
</pallas_src>

<mosaic_0001>
module attributes {stable_mosaic.version = 11 : i64} {
  func.func @_cv1_split_kernel(%arg0: i32, %arg1: memref<512x4xf32, #tpu.memory_space<vmem>>, %arg2: memref<4x4xf32, #tpu.memory_space<vmem>>, %arg3: memref<1x4xf32, #tpu.memory_space<vmem>>, %arg4: memref<512x2xf32, #tpu.memory_space<vmem>>, %arg5: memref<512x2xf32, #tpu.memory_space<vmem>>) attributes {dimension_semantics = [#tpu.dimension_semantics<parallel>], iteration_bounds = array<i64: 1>, scalar_prefetch = 0 : i64, scratch_operands = 0 : i64, tpu.core_type = #tpu.core_type<tc>, window_params = [{transform_indices = @transform_0, window_bounds = array<i64: 512, 4>}, {pipeline_mode = #tpu.pipeline_mode<synchronous>, transform_indices = @transform_1, window_bounds = array<i64: 4, 4>}, {pipeline_mode = #tpu.pipeline_mode<synchronous>, transform_indices = @transform_2, window_bounds = array<i64: 1, 4>}, {transform_indices = @transform_3, window_bounds = array<i64: 512, 2>}, {transform_indices = @transform_4, window_bounds = array<i64: 512, 2>}]} {
    %c0 = arith.constant 0 : index
    %c0_0 = arith.constant 0 : index
    %0 = vector.load %arg1[%c0, %c0_0] : memref<512x4xf32, #tpu.memory_space<vmem>>, vector<512x4xf32>
    %c0_1 = arith.constant 0 : index
    %c0_2 = arith.constant 0 : index
    %1 = vector.load %arg2[%c0_1, %c0_2] : memref<4x4xf32, #tpu.memory_space<vmem>>, vector<4x4xf32>
    %cst = arith.constant dense<0.000000e+00> : vector<512x4xf32>
    %2 = tpu.matmul %0, %1, %cst {dimension_numbers = #tpu.dot_dimension_numbers<[1], [0], [0], [1], [0, 0, 1, 1], [], []>} : vector<512x4xf32>, vector<4x4xf32>, vector<512x4xf32> -> vector<512x4xf32>
    %c0_3 = arith.constant 0 : index
    %c0_4 = arith.constant 0 : index
    %3 = vector.load %arg3[%c0_3, %c0_4] : memref<1x4xf32, #tpu.memory_space<vmem>>, vector<1x4xf32>
    %4 = vector.broadcast %3 : vector<1x4xf32> to vector<512x4xf32>
    %5 = arith.addf %2, %4 : vector<512x4xf32>
    %6 = arith.negf %5 : vector<512x4xf32>
    %7 = math.exp %6 : vector<512x4xf32>
    %cst_5 = arith.constant 1.000000e+00 : f32
    %8 = vector.broadcast %cst_5 : f32 to vector<512x4xf32>
    %9 = arith.addf %8, %7 : vector<512x4xf32>
    %10 = arith.divf %8, %9 : vector<512x4xf32>
    %11 = arith.mulf %5, %10 : vector<512x4xf32>
    %12 = vector.extract_strided_slice %11 {offsets = [0, 0], sizes = [512, 2], strides = [1, 1]} : vector<512x4xf32> to vector<512x2xf32>
    %c0_6 = arith.constant 0 : index
    %c0_7 = arith.constant 0 : index
    %13 = vector.load %arg4[%c0_6, %c0_7] : memref<512x2xf32, #tpu.memory_space<vmem>>, vector<512x2xf32>
    tpu.vector_store %arg4[%c0_6, %c0_7], %12 {strides = array<i32>} : memref<512x2xf32, #tpu.memory_space<vmem>>, vector<512x2xf32>,
    %14 = vector.extract_strided_slice %11 {offsets = [0, 2], sizes = [512, 2], strides = [1, 1]} : vector<512x4xf32> to vector<512x2xf32>
    %c0_8 = arith.constant 0 : index
    %c0_9 = arith.constant 0 : index
    %15 = vector.load %arg5[%c0_8, %c0_9] : memref<512x2xf32, #tpu.memory_space<vmem>>, vector<512x2xf32>
    tpu.vector_store %arg5[%c0_8, %c0_9], %14 {strides = array<i32>} : memref<512x2xf32, #tpu.memory_space<vmem>>, vector<512x2xf32>,
    return
  }
  func.func @transform_0(%arg0: i32) -> (i32, i32) {
    %c0_i32 = arith.constant 0 : i32
    %c0_i32_0 = arith.constant 0 : i32
    return %arg0, %c0_i32 : i32, i32
  }
  func.func @transform_1(%arg0: i32) -> (i32, i32) {
    %c0_i32 = arith.constant 0 : i32
    %c0_i32_0 = arith.constant 0 : i32
    %c0_i32_1 = arith.constant 0 : i32
    return %c0_i32, %c0_i32_0 : i32, i32
  }
  func.func @transform_2(%arg0: i32) -> (i32, i32) {
    %c0_i32 = arith.constant 0 : i32
    %c0_i32_0 = arith.constant 0 : i32
    %c0_i32_1 = arith.constant 0 : i32
    return %c0_i32, %c0_i32_0 : i32, i32
  }
  func.func @transform_3(%arg0: i32) -> (i32, i32) {
    %c0_i32 = arith.constant 0 : i32
    %c0_i32_0 = arith.constant 0 : i32
    return %arg0, %c0_i32 : i32, i32
  }
  func.func @transform_4(%arg0: i32) -> (i32, i32) {
    %c0_i32 = arith.constant 0 : i32
    %c0_i32_0 = arith.constant 0 : i32
    return %arg0, %c0_i32 : i32, i32
  }
}

</mosaic_0001>

<bundles_post_ra>
// kernel: tpu_custom_call.1
= control target key start
LH: loop header
LB: loop body
LE: loop exit
PB: predicated region body
PF: predicated region fallthrough
CT: control target
= control target key end

     0   :  { %vm278_vm0 = vcmask 1043456   ;;  %vm85_vm1 = vcmask 31744   ;;  %vm1771_vm8 = vcmask 15360   ;;  %s2556_s10 = smov 126   ;;  %s5192_s1 = inlined_call_operand.vmem [shape: f32[4,4], index: 1, kind: input, shape index: {}]   ;;  %s5193_s0 = inlined_call_operand.vmem [shape: f32[512,4], index: 0, kind: input, shape index: {}]   ;;  %s5194_s2 = inlined_call_operand.vmem [shape: f32[1,4], index: 2, kind: input, shape index: {}]   ;;  %s5195_s3 = inlined_call_operand.vmem [shape: f32[512,2], index: 3, kind: output, shape index: {0}]   ;;  %s5196_s4 = inlined_call_operand.vmem [shape: f32[512,2], index: 4, kind: output, shape index: {1}]  }
   0x1   :  { %v80_v0 = vld [vmem:[%s5192_s1] sm:$0xf]  ;;  %v17_v5 = vld [vmem:[%s5193_s0 + $0x8] sm:$0xff]  ;;  %v18_v9 = vld [vmem:[%s5193_s0 + $0x10] sm:$0xff] }
   0x2   :  { %v16_v1 = vld [vmem:[%s5193_s0] sm:$0xff]  ;;  %2164 = vmatpush.msk.msra.mxu0 %vm278_vm0, %v80_v0  ;;  %2293 = vmatpush.msk.msra.mxu1 %vm278_vm0, %v80_v0  ;;  %v33_v6 = vld [vmem:[%s5193_s0 + $0x88] sm:$0xff]  ;;  %v34_v10 = vld [vmem:[%s5193_s0 + $0x90] sm:$0xff] }
   0x3   :  { %v32_v2 = vld [vmem:[%s5193_s0 + $0x80] sm:$0xff]  ;;  %2294 = vmatpush.msk.msra.mxu2 %vm278_vm0, %v80_v0  ;;  %2295 = vmatpush.msk.msra.mxu3 %vm278_vm0, %v80_v0  ;;  %v49_v7 = vld [vmem:[%s5193_s0 + $0x108] sm:$0xff]  ;;  %v50_v11 = vld [vmem:[%s5193_s0 + $0x110] sm:$0xff] }
   0x4   :  { %v48_v3 = vld [vmem:[%s5193_s0 + $0x100] sm:$0xff]  ;;  %2165 = vmatmul.msk.f32.vlgmr.msra.gmra.mxu0 %vm85_vm1, %v16_v1  ;;  %2181 = vmatmul.msk.f32.vlgmr.msra.gmra.mxu1 %vm85_vm1, %v32_v2  ;;  %v65_v8 = vld [vmem:[%s5193_s0 + $0x188] sm:$0xff]  ;;  %v66_v12 = vld [vmem:[%s5193_s0 + $0x190] sm:$0xff] }
   0x5   :  { %v64_v4 = vld [vmem:[%s5193_s0 + $0x180] sm:$0xff]  ;;  %2197 = vmatmul.msk.f32.vlgmr.msra.gmra.mxu2 %vm85_vm1, %v48_v3  ;;  %v19_v13 = vld [vmem:[%s5193_s0 + $0x18] sm:$0xff]  ;;  %v21_v21 = vld [vmem:[%s5193_s0 + $0x28] sm:$0xff] }
   0x6   :  { %2213 = vmatmul.msk.f32.vlgmr.msra.gmra.mxu3 %vm85_vm1, %v64_v4  ;;  %v35_v14 = vld [vmem:[%s5193_s0 + $0x98] sm:$0xff]  ;;  %v20_v17 = vld [vmem:[%s5193_s0 + $0x20] sm:$0xff]  ;;  %v37_v22 = vld [vmem:[%s5193_s0 + $0xa8] sm:$0xff] }
   0x7   :  { %v51_v15 = vld [vmem:[%s5193_s0 + $0x118] sm:$0xff]  ;;  %v36_v18 = vld [vmem:[%s5193_s0 + $0xa0] sm:$0xff]  ;;  %v53_v23 = vld [vmem:[%s5193_s0 + $0x128] sm:$0xff] }
   0x8   :  { %v67_v16 = vld [vmem:[%s5193_s0 + $0x198] sm:$0xff]  ;;  %v52_v19 = vld [vmem:[%s5193_s0 + $0x120] sm:$0xff]  ;;  %v69_v24 = vld [vmem:[%s5193_s0 + $0x1a8] sm:$0xff] }
   0x9   :  { %v68_v20 = vld [vmem:[%s5193_s0 + $0x1a0] sm:$0xff]  ;;  %v22_v25 = vld [vmem:[%s5193_s0 + $0x30] sm:$0xff]  ;;  %v23_v29 = vld [vmem:[%s5193_s0 + $0x38] sm:$0xff] }
   0xa   :  { %v38_v26 = vld [vmem:[%s5193_s0 + $0xb0] sm:$0xff]  ;;  %v39_v30 = vld [vmem:[%s5193_s0 + $0xb8] sm:$0xff]  ;;  %v24_v33 = vld [vmem:[%s5193_s0 + $0x40] sm:$0xff] }
   0xb   :  { %v54_v27 = vld [vmem:[%s5193_s0 + $0x130] sm:$0xff]  ;;  %v55_v31 = vld [vmem:[%s5193_s0 + $0x138] sm:$0xff]  ;;  %v40_v34 = vld [vmem:[%s5193_s0 + $0xc0] sm:$0xff] }
   0xc   :  { %2166 = vmatmul.msk.f32.gmra.mxu0 %vm85_vm1, %v17_v5  ;;  %2182 = vmatmul.msk.f32.gmra.mxu1 %vm85_vm1, %v33_v6  ;;  %v70_v28 = vld [vmem:[%s5193_s0 + $0x1b0] sm:$0xff]  ;;  %v71_v32 = vld [vmem:[%s5193_s0 + $0x1b8] sm:$0xff]  ;;  %v56_v35 = vld [vmem:[%s5193_s0 + $0x140] sm:$0xff] }
   0xd   :  { %2198 = vmatmul.msk.f32.gmra.mxu2 %vm85_vm1, %v49_v7  ;;  %v72_v36 = vld [vmem:[%s5193_s0 + $0x1c0] sm:$0xff]  ;;  %v25_v37 = vld [vmem:[%s5193_s0 + $0x48] sm:$0xff]  ;;  %v26_v41 = vld [vmem:[%s5193_s0 + $0x50] sm:$0xff] }
   0xe   :  { %2214 = vmatmul.msk.f32.gmra.mxu3 %vm85_vm1, %v65_v8  ;;  %v41_v38 = vld [vmem:[%s5193_s0 + $0xc8] sm:$0xff]  ;;  %v42_v42 = vld [vmem:[%s5193_s0 + $0xd0] sm:$0xff]  ;;  %v27_v45 = vld [vmem:[%s5193_s0 + $0x58] sm:$0xff] }
   0xf   :  { %v57_v39 = vld [vmem:[%s5193_s0 + $0x148] sm:$0xff]  ;;  %v58_v43 = vld [vmem:[%s5193_s0 + $0x150] sm:$0xff]  ;;  %v43_v46 = vld [vmem:[%s5193_s0 + $0xd8] sm:$0xff] }
  0x10   :  { %v73_v40 = vld [vmem:[%s5193_s0 + $0x1c8] sm:$0xff]  ;;  %v74_v44 = vld [vmem:[%s5193_s0 + $0x1d0] sm:$0xff]  ;;  %v59_v47 = vld [vmem:[%s5193_s0 + $0x158] sm:$0xff] }
  0x11   :  { %v75_v48 = vld [vmem:[%s5193_s0 + $0x1d8] sm:$0xff]  ;;  %v28_v49 = vld [vmem:[%s5193_s0 + $0x60] sm:$0xff]  ;;  %v29_v53 = vld [vmem:[%s5193_s0 + $0x68] sm:$0xff] }
  0x12   :  { %v44_v50 = vld [vmem:[%s5193_s0 + $0xe0] sm:$0xff]  ;;  %v45_v54 = vld [vmem:[%s5193_s0 + $0xe8] sm:$0xff]  ;;  %v30_v57 = vld [vmem:[%s5193_s0 + $0x70] sm:$0xff] }
  0x13   :  { %v60_v51 = vld [vmem:[%s5193_s0 + $0x160] sm:$0xff]  ;;  %v61_v55 = vld [vmem:[%s5193_s0 + $0x168] sm:$0xff]  ;;  %v46_v58 = vld [vmem:[%s5193_s0 + $0xf0] sm:$0xff] }
  0x14   :  { %2167 = vmatmul.msk.f32.gmra.mxu0 %vm85_vm1, %v18_v9  ;;  %2183 = vmatmul.msk.f32.gmra.mxu1 %vm85_vm1, %v34_v10  ;;  %v76_v52 = vld [vmem:[%s5193_s0 + $0x1e0] sm:$0xff]  ;;  %v77_v56 = vld [vmem:[%s5193_s0 + $0x1e8] sm:$0xff]  ;;  %v62_v59 = vld [vmem:[%s5193_s0 + $0x170] sm:$0xff] }
  0x15   :  { %2199 = vmatmul.msk.f32.gmra.mxu2 %vm85_vm1, %v50_v11  ;;  %v78_v60 = vld [vmem:[%s5193_s0 + $0x1f0] sm:$0xff]  ;;  %v31_v61 = vld [vmem:[%s5193_s0 + $0x78] sm:$0xff]  ;;  %v2840_v0 = vld [vmem:[%s5194_s2] ss:$0 sm:$0xff] }
  0x16   :  { %2215 = vmatmul.msk.f32.gmra.mxu3 %vm85_vm1, %v66_v12  ;;  %v47_v62 = vld [vmem:[%s5193_s0 + $0xf8] sm:$0xff] }
  0x17   :  { %v79_v63 = vld [vmem:[%s5193_s0 + $0x1f8] sm:$0xff] }
  0x1c   :  { %2168 = vmatmul.msk.f32.gmra.mxu0 %vm85_vm1, %v19_v13  ;;  %2184 = vmatmul.msk.f32.gmra.mxu1 %vm85_vm1, %v35_v14 }
  0x1d   :  { %2200 = vmatmul.msk.f32.gmra.mxu2 %vm85_vm1, %v51_v15 }
  0x1e   :  { %2216 = vmatmul.msk.f32.gmra.mxu3 %vm85_vm1, %v67_v16 }
  0x24   :  { %2169 = vmatmul.msk.f32.gmra.mxu0 %vm85_vm1, %v20_v17  ;;  %2185 = vmatmul.msk.f32.gmra.mxu1 %vm85_vm1, %v36_v18 }
  0x25   :  { %2201 = vmatmul.msk.f32.gmra.mxu2 %vm85_vm1, %v52_v19 }
  0x26   :  { %2217 = vmatmul.msk.f32.gmra.mxu3 %vm85_vm1, %v68_v20 }
  0x2c   :  { %2170 = vmatmul.msk.f32.gmra.mxu0 %vm85_vm1, %v21_v21  ;;  %2186 = vmatmul.msk.f32.gmra.mxu1 %vm85_vm1, %v37_v22 }
  0x2d   :  { %2202 = vmatmul.msk.f32.gmra.mxu2 %vm85_vm1, %v53_v23 }
  0x2e   :  { %2218 = vmatmul.msk.f32.gmra.mxu3 %vm85_vm1, %v69_v24 }
  0x34   :  { %2171 = vmatmul.msk.f32.gmra.mxu0 %vm85_vm1, %v22_v25  ;;  %2187 = vmatmul.msk.f32.gmra.mxu1 %vm85_vm1, %v38_v26 }
  0x35   :  { %2203 = vmatmul.msk.f32.gmra.mxu2 %vm85_vm1, %v54_v27  ;;  %v63_v27 = vld [vmem:[%s5193_s0 + $0x178] sm:$0xff] }
  0x36   :  { %2219 = vmatmul.msk.f32.gmra.mxu3 %vm85_vm1, %v70_v28 }
  0x3c   :  { %2172 = vmatmul.msk.f32.gmra.mxu0 %vm85_vm1, %v23_v29  ;;  %2188 = vmatmul.msk.f32.gmra.mxu1 %vm85_vm1, %v39_v30 }
  0x3d   :  { %2204 = vmatmul.msk.f32.gmra.mxu2 %vm85_vm1, %v55_v31 }
  0x3e   :  { %2220 = vmatmul.msk.f32.gmra.mxu3 %vm85_vm1, %v71_v32 }
  0x44   :  { %2173 = vmatmul.msk.f32.gmra.mxu0 %vm85_vm1, %v24_v33  ;;  %2189 = vmatmul.msk.f32.gmra.mxu1 %vm85_vm1, %v40_v34 }
  0x45   :  { %2205 = vmatmul.msk.f32.gmra.mxu2 %vm85_vm1, %v56_v35 }
  0x46   :  { %2221 = vmatmul.msk.f32.gmra.mxu3 %vm85_vm1, %v72_v36 }
  0x4c   :  { %2174 = vmatmul.msk.f32.gmra.mxu0 %vm85_vm1, %v25_v37  ;;  %2190 = vmatmul.msk.f32.gmra.mxu1 %vm85_vm1, %v41_v38 }
  0x4d   :  { %2206 = vmatmul.msk.f32.gmra.mxu2 %vm85_vm1, %v57_v39 }
  0x4e   :  { %2222 = vmatmul.msk.f32.gmra.mxu3 %vm85_vm1, %v73_v40 }
  0x54   :  { %2175 = vmatmul.msk.f32.gmra.mxu0 %vm85_vm1, %v26_v41  ;;  %2191 = vmatmul.msk.f32.gmra.mxu1 %vm85_vm1, %v42_v42 }
  0x55   :  { %2207 = vmatmul.msk.f32.gmra.mxu2 %vm85_vm1, %v58_v43 }
  0x56   :  { %2223 = vmatmul.msk.f32.gmra.mxu3 %vm85_vm1, %v74_v44 }
  0x5c   :  { %2176 = vmatmul.msk.f32.gmra.mxu0 %vm85_vm1, %v27_v45  ;;  %2192 = vmatmul.msk.f32.gmra.mxu1 %vm85_vm1, %v43_v46 }
  0x5d   :  { %2208 = vmatmul.msk.f32.gmra.mxu2 %vm85_vm1, %v59_v47 }
  0x5e   :  { %2224 = vmatmul.msk.f32.gmra.mxu3 %vm85_vm1, %v75_v48 }
  0x64   :  { %2177 = vmatmul.msk.f32.gmra.mxu0 %vm85_vm1, %v28_v49  ;;  %2193 = vmatmul.msk.f32.gmra.mxu1 %vm85_vm1, %v44_v50 }
  0x65   :  { %2209 = vmatmul.msk.f32.gmra.mxu2 %vm85_vm1, %v60_v51 }
  0x66   :  { %2225 = vmatmul.msk.f32.gmra.mxu3 %vm85_vm1, %v76_v52 }
  0x6c   :  { %2178 = vmatmul.msk.f32.gmra.mxu0 %vm85_vm1, %v29_v53  ;;  %2194 = vmatmul.msk.f32.gmra.mxu1 %vm85_vm1, %v45_v54 }
  0x6d   :  { %2210 = vmatmul.msk.f32.gmra.mxu2 %vm85_vm1, %v61_v55 }
  0x6e   :  { %2226 = vmatmul.msk.f32.gmra.mxu3 %vm85_vm1, %v77_v56 }
  0x74   :  { %2179 = vmatmul.msk.f32.gmra.mxu0 %vm85_vm1, %v30_v57  ;;  %2195 = vmatmul.msk.f32.gmra.mxu1 %vm85_vm1, %v46_v58 }
  0x75   :  { %2211 = vmatmul.msk.f32.gmra.mxu2 %vm85_vm1, %v62_v59 }
  0x76   :  { %2227 = vmatmul.msk.f32.gmra.mxu3 %vm85_vm1, %v78_v60 }
  0x7c   :  { %2180 = vmatmul.msk.f32.gmra.mxu0 %vm85_vm1, %v31_v61  ;;  %2196 = vmatmul.msk.f32.gmra.mxu1 %vm85_vm1, %v47_v62 }
  0x7d   :  { %2212 = vmatmul.msk.f32.gmra.mxu2 %vm85_vm1, %v63_v27 }
  0x7e   :  { %2228 = vmatmul.msk.f32.gmra.mxu3 %vm85_vm1, %v79_v63 }
  0x81   :  { %v299_v1 = vpop.f32.mrf.mxu0  ;;  %v347_v2 = vpop.f32.mrf.mxu1 }
  0x82   :  { %v2843_v3 = vadd.f32 %v2840_v0, %v299_v1  ;;  %v2846_v4 = vadd.f32 %v2840_v0, %v347_v2 }
  0x84   :  { %v2245_v5 = vmul.f32 -1.442695, %v2846_v4  ;;  %v2229_v6 = vmul.f32 -1.442695, %v2843_v3 }
  0x86   :  { %2298 = vpow2.f32 %v2245_v5 }
  0x87   :  { %2300 = vpow2.f32 %v2229_v6 }
  0x88   :  { %v395_v7 = vpop.f32.mrf.mxu2 }
  0x89   :  { %v443_v8 = vpop.f32.mrf.mxu3  ;;  %v302_v10 = vpop.f32.mrf.mxu0  ;;  %v2860_v14 = vadd.f32 %v2840_v0, %v395_v7 }
  0x8a   :  { %v2851_v9 = vadd.f32 %v2840_v0, %v443_v8  ;;  %v350_v11 = vpop.f32.mrf.mxu1  ;;  %v2854_v12 = vadd.f32 %v2840_v0, %v302_v10 }
  0x8b   :  { %v2857_v13 = vadd.f32 %v2840_v0, %v350_v11  ;;  %v2261_v20 = vmul.f32 -1.442695, %v2860_v14 }
  0x8c   :  { %v2277_v15 = vmul.f32 -1.442695, %v2851_v9  ;;  %v2299_v16 = vpop.eup %2298  ;;  %v2230_v17 = vmul.f32 -1.442695, %v2854_v12 }
  0x8d   :  { %v2246_v18 = vmul.f32 -1.442695, %v2857_v13  ;;  %v2301_v19 = vpop.eup %2300  ;;  %v2866_v21 = vadd.f32 1.0, %v2299_v16 }
  0x8e   :  { %2302 = vpow2.f32 %v2277_v15  ;;  %v2877_v28 = vadd.f32 1.0, %v2301_v19 }
  0x8f   :  { %2304 = vpow2.f32 %v2230_v17 }
  0x90   :  { %v398_v22 = vpop.f32.mrf.mxu2  ;;  %2306 = vpow2.f32 %v2246_v18 }
  0x91   :  { %v446_v23 = vpop.f32.mrf.mxu3  ;;  %v2869_v24 = vadd.f32 %v2840_v0, %v398_v22  ;;  %v305_v26 = vpop.f32.mrf.mxu0  ;;  %2308 = vpow2.f32 %v2261_v20 }
  0x92   :  { %v2872_v25 = vadd.f32 %v2840_v0, %v446_v23  ;;  %v2880_v29 = vadd.f32 %v2840_v0, %v305_v26  ;;  %2310 = vrcp.f32 %v2866_v21  ;;  %v353_v33 = vpop.f32.mrf.mxu1 }
  0x93   :  { %v2262_v30 = vmul.f32 -1.442695, %v2869_v24  ;;  %v2892_v37 = vadd.f32 %v2840_v0, %v353_v33 }
  0x94   :  { %v2303_v31 = vpop.eup %2302  ;;  %v2278_v32 = vmul.f32 -1.442695, %v2872_v25  ;;  %v2231_v35 = vmul.f32 -1.442695, %v2880_v29 }
  0x95   :  { %v2886_v34 = vadd.f32 1.0, %v2303_v31  ;;  %2312 = vpow2.f32 %v2262_v30  ;;  %v2305_v36 = vpop.eup %2304  ;;  %v2247_v47 = vmul.f32 -1.442695, %v2892_v37 }
  0x96   :  { %2314 = vrcp.f32 %v2877_v28  ;;  %v2307_v38 = vpop.eup %2306  ;;  %v2894_v39 = vadd.f32 1.0, %v2305_v36 }
  0x97   :  { %2316 = vrcp.f32 %v2886_v34  ;;  %v2896_v40 = vpop.eup %2308  ;;  %v1478_v41 = vand.u32 2147483648, %v2886_v34  ;;  %v2899_v42 = vadd.f32 1.0, %v2307_v38  ;;  %v1476_v44 = vand.u32 2147483647, %v2886_v34 }
  0x98   :  { %2318 = vpow2.f32 %v2278_v32  ;;  %v2901_v43 = vpop.eup %2310  ;;  %v773_v46 = vand.u32 2147483648, %v2894_v39  ;;  %v401_v48 = vpop.f32.mrf.mxu2  ;;  %vm1472_vm2 = vweird.f32 %v2886_v34  ;;  %vm767_vm3 = vweird.f32 %v2894_v39 }
  0x99   :  { %2320 = vpow2.f32 %v2231_v35  ;;  %v1011_v50 = vand.u32 2147483647, %v2899_v42  ;;  %v1013_v51 = vand.u32 2147483648, %v2899_v42  ;;  %v449_v53 = vpop.f32.mrf.mxu3  ;;  %v1479_v55 = vor.u32 1.1754944e-38, %v1478_v41  ;;  %v308_v11 = vpop.f32.mrf.mxu0 }
  0x9a   :  { %2322 = vrcp.f32 %v2894_v39  ;;  %v771_v56 = vand.u32 2147483647, %v2894_v39  ;;  %v2919_v57 = vmul.f32 %v2901_v43, %v2866_v21  ;;  %vm2922_vm4 = vcmp.eq.f32.partialorder %v1476_v44, 8.507059e+37 }
  0x9b   :  { %v2313_v45 = vpop.eup %2312  ;;  %2324 = vrcp.f32 %v2899_v42  ;;  %vm1007_vm5 = vweird.f32 %v2899_v42  ;;  %v2929_v61 = vadd.f32 %v2840_v0, %v401_v48  ;;  %v2931_v63 = vor.u32 1.1754944e-38, %v773_v46 }
  0x9c   :  { %v2908_v49 = vpop.eup %2314  ;;  %v2913_v52 = vadd.f32 1.0, %v2313_v45  ;;  %v2936_v2 = vadd.f32 %v2840_v0, %v449_v53  ;;  %vm2938_vm7 = vcmp.eq.f32.partialorder %v1011_v50, 8.507059e+37  ;;  %v1014_v8 = vor.u32 1.1754944e-38, %v1013_v51 }
  0x9d   :  { %v2317_v54 = vpop.eup %2316  ;;  %vm2945_vm9 = vcmp.eq.f32.partialorder %v771_v56, 8.507059e+37  ;;  %v2955_v23 = vmul.f32 -1.442695, %v2929_v61  ;;  %v2961_v30 = vadd.f32 %v2840_v0, %v308_v11 }
  0x9e   :  { %v2319_v58 = vpop.eup %2318  ;;  %v1468_v59 = vmul.f32 %v2317_v54, %v2886_v34  ;;  %2326 = vrcp.f32 %v2913_v52  ;;  %vm1473_vm6 = vweird.f32 %v2317_v54  ;;  %vm1247_vm10 = vweird.f32 %v2913_v52 }
  0x9f   :  { %v2321_v62 = vpop.eup %2320  ;;  %v2933_v1 = vadd.f32 1.0, %v2319_v58  ;;  %2328 = vpow2.f32 %v2247_v47  ;;  %v1251_v18 = vand.u32 2147483647, %v2913_v52  ;;  %v1253_v19 = vand.u32 2147483648, %v2913_v52  ;;  %vm1474_vm13 = vmor %vm1472_vm2, %vm1473_vm6 }
  0xa0   :  { %v2323_v5 = vpop.eup %2322  ;;  %v1469_v6 = vsub.f32 1.0, %v1468_v59  ;;  %v2942_v10 = vadd.f32 1.0, %v2321_v62  ;;  %v2958_v27 = vmul.f32 -1.442695, %v2936_v2  ;;  %v2232_v17 = vmul.f32 -1.442695, %v2961_v30 }
  0xa1   :  { %v2325_v15 = vpop.eup %2324  ;;  %v763_v16 = vmul.f32 %v2323_v5, %v2894_v39  ;;  %2330 = vrcp.f32 %v2933_v1  ;;  %vm768_vm11 = vweird.f32 %v2323_v5  ;;  %v1491_v41 = vand.u32 2147483647, %v2933_v1 }
  0xa2   :  { %v1470_v20 = vmul.f32 %v2317_v54, %v1469_v6  ;;  %v1003_v22 = vmul.f32 %v2325_v15, %v2899_v42  ;;  %vm1008_vm12 = vweird.f32 %v2325_v15  ;;  %2332 = vrcp.f32 %v2942_v10  ;;  %vm769_vm2 = vmor %vm767_vm3, %vm768_vm11 }
  0xa3   :  { %v764_v26 = vsub.f32 1.0, %v763_v16  ;;  %v1493_v44 = vand.u32 2147483648, %v2933_v1  ;;  %vm2970_vm14 = vcmp.eq.f32.partialorder %v1251_v18, 8.507059e+37  ;;  %v1254_v48 = vor.u32 1.1754944e-38, %v1253_v19  ;;  %vm2978_vm15 = vmor %vm1007_vm5, %vm1008_vm12 }
  0xa4   :  { %v2327_v31 = vpop.eup %2326  ;;  %v1471_v32 = vadd.f32 %v2317_v54, %v1470_v20  ;;  %v1004_v33 = vsub.f32 1.0, %v1003_v22  ;;  %vm1487_vm1 = vweird.f32 %v2933_v1  ;;  %v788_v42 = vand.u32 2147483648, %v2942_v10 }
  0xa5   :  { %v2329_v35 = vpop.eup %2328  ;;  %v765_v36 = vmul.f32 %v2323_v5, %v764_v26  ;;  %v1243_v38 = vmul.f32 %v2327_v31, %v2913_v52  ;;  %vm1248_vm0 = vweird.f32 %v2327_v31  ;;  %vm2994_vm5 = vcmp.eq.f32.partialorder %v1491_v41, 8.507059e+37 }
  0xa6   :  { %v1475_v45 = vsel %vm1474_vm13, %v2317_v54, %v1471_v32  ;;  %v1005_v46 = vmul.f32 %v2325_v15, %v1004_v33  ;;  %v356_v54 = vpop.f32.mrf.mxu1  ;;  %v2991_v59 = vadd.f32 1.0, %v2329_v35  ;;  %v786_v18 = vand.u32 2147483647, %v2942_v10  ;;  %vm1249_vm3 = vmor %vm1247_vm10, %vm1248_vm0 }
  0xa7   :  { %v1480_v50 = vsel %vm2922_vm4, %v1479_v55, %v1475_v45  ;;  %v766_v51 = vadd.f32 %v2323_v5, %v765_v36  ;;  %v1244_v53 = vsub.f32 1.0, %v1243_v38  ;;  %v2331_v56 = vpop.eup %2330  ;;  %vm782_vm4 = vweird.f32 %v2942_v10  ;;  %v311_v45 = vpop.f32.mrf.mxu0 }
  0xa8   :  { %v2984_v58 = vmul.f32 %v1480_v50, %v2851_v9  ;;  %v1006_v55 = vadd.f32 %v2325_v15, %v1005_v46  ;;  %v1483_v6 = vmul.f32 %v2331_v56, %v2933_v1  ;;  %v1494_v9 = vor.u32 1.1754944e-38, %v1493_v44  ;;  %v2333_v16 = vpop.eup %2332 }
  0xa9   :  { %v770_v60 = vsel %vm769_vm2, %v2323_v5, %v766_v51  ;;  %v1245_v62 = vmul.f32 %v2327_v31, %v1244_v53  ;;  %2334 = vrcp.f32 %v2991_v59  ;;  %vm1488_vm6 = vweird.f32 %v2331_v56 }
  0xaa   :  { %1820 = vst.msk [vmem:[%s5195_s3 + $0x180] sm:$0xff] %vm1771_vm8, %v2984_v58  ;;  %v775_v39 = vsel %vm2945_vm9, %v2931_v63, %v770_v60  ;;  %v1010_v5 = vsel %vm2978_vm15, %v2325_v15, %v1006_v55  ;;  %v1484_v26 = vsub.f32 1.0, %v1483_v6  ;;  %v778_v63 = vmul.f32 %v2333_v16, %v2942_v10  ;;  %vm1489_vm10 = vmor %vm1487_vm1, %vm1488_vm6 }
  0xab   :  { %v3011_v19 = vmul.f32 %v775_v39, %v2854_v12  ;;  %v1015_v20 = vsel %vm2938_vm7, %v1014_v8, %v1010_v5  ;;  %v1246_v22 = vadd.f32 %v2327_v31, %v1245_v62  ;;  %v789_v15 = vor.u32 1.1754944e-38, %v788_v42 }
  0xac   :  { %v3016_v32 = vmul.f32 %v1015_v20, %v2857_v13  ;;  %v1485_v7 = vmul.f32 %v2331_v56, %v1484_v26  ;;  %vm783_vm7 = vweird.f32 %v2333_v16  ;;  %vm1022_vm9 = vweird.f32 %v2991_v59  ;;  %v404_v13 = vpop.f32.mrf.mxu2 }
  0xad   :  { %1773 = vst.msk [vmem:[%s5195_s3 + $0x8] sm:$0xff] %vm1771_vm8, %v3011_v19  ;;  %v1250_v12 = vsel %vm1249_vm3, %v2327_v31, %v1246_v22  ;;  %v779_v8 = vsub.f32 1.0, %v778_v63  ;;  %2336 = vpow2.f32 %v2955_v23  ;;  %v1026_v35 = vand.u32 2147483647, %v2991_v59  ;;  %vm784_vm12 = vmor %vm782_vm4, %vm783_vm7 }
  0xae   :  { %1789 = vst.msk [vmem:[%s5195_s3 + $0x88] sm:$0xff] %vm1771_vm8, %v3016_v32  ;;  %v1255_v52 = vsel %vm2970_vm14, %v1254_v48, %v1250_v12  ;;  %v1486_v33 = vadd.f32 %v2331_v56, %v1485_v7  ;;  %v1028_v36 = vand.u32 2147483648, %v2991_v59  ;;  %2338 = vpow2.f32 %v2958_v27  ;;  %v359_v27 = vpop.f32.mrf.mxu1 }
  0xaf   :  { %v3038_v31 = vmul.f32 %v1255_v52, %v2869_v24  ;;  %v2335_v38 = vpop.eup %2334  ;;  %v780_v41 = vmul.f32 %v2333_v16, %v779_v8  ;;  %v3047_v23 = vadd.f32 %v2840_v0, %v356_v54  ;;  %v3050_v44 = vadd.f32 %v2840_v0, %v404_v13  ;;  %v452_v24 = vpop.f32.mrf.mxu3 }
  0xb0   :  { %v1490_v46 = vsel %vm1489_vm10, %v2331_v56, %v1486_v33  ;;  %v1018_v1 = vmul.f32 %v2335_v38, %v2991_v59  ;;  %vm1023_vm11 = vweird.f32 %v2335_v38  ;;  %2340 = vpow2.f32 %v2232_v17 }
  0xb1   :  { %1805 = vst.msk [vmem:[%s5195_s3 + $0x108] sm:$0xff] %vm1771_vm8, %v3038_v31  ;;  %v1495_v47 = vsel %vm2994_vm5, %v1494_v9, %v1490_v46  ;;  %v781_v48 = vadd.f32 %v2333_v16, %v780_v41  ;;  %v2248_v50 = vmul.f32 -1.442695, %v3047_v23  ;;  %v2264_v51 = vmul.f32 -1.442695, %v3050_v44  ;;  %vm3090_vm14 = vmor %vm1022_vm9, %vm1023_vm11 }
  0xb2   :  { %v3063_v34 = vmul.f32 %v1495_v47, %v2872_v25  ;;  %v1019_v53 = vsub.f32 1.0, %v1018_v1  ;;  %v3069_v54 = vadd.f32 %v2840_v0, %v452_v24  ;;  %v3072_v56 = vadd.f32 %v2840_v0, %v311_v45 }
  0xb3   :  { %v2337_v55 = vpop.eup %2336  ;;  %v785_v42 = vsel %vm784_vm12, %v2333_v16, %v781_v48  ;;  %vm787_vm13 = vcmp.eq.f32.partialorder %v786_v18, 8.507059e+37  ;;  %2342 = vpow2.f32 %v2248_v50  ;;  %v3075_v60 = vadd.f32 %v2840_v0, %v359_v27 }
  0xb4   :  { %1821 = vst.msk [vmem:[%s5195_s3 + $0x188] sm:$0xff] %vm1771_vm8, %v3063_v34  ;;  %v790_v25 = vsel %vm787_vm13, %v789_v15, %v785_v42  ;;  %v1020_v10 = vmul.f32 %v2335_v38, %v1019_v53  ;;  %v3082_v62 = vadd.f32 1.0, %v2337_v55  ;;  %2344 = vpow2.f32 %v2264_v51  ;;  %v2339_v6 = vpop.eup %2338 }
  0xb5   :  { %v3085_v11 = vmul.f32 %v790_v25, %v2880_v29  ;;  %v1029_v16 = vor.u32 1.1754944e-38, %v1028_v36  ;;  %v2280_v39 = vmul.f32 -1.442695, %v3069_v54  ;;  %v2233_v5 = vmul.f32 -1.442695, %v3072_v56 }
  0xb6   :  { %v2341_v18 = vpop.eup %2340  ;;  %v1021_v20 = vadd.f32 %v2335_v38, %v1020_v10  ;;  %vm1027_vm15 = vcmp.eq.f32.partialorder %v1026_v35, 8.507059e+37  ;;  %2346 = vrcp.f32 %v3082_v62  ;;  %v3098_v29 = vadd.f32 1.0, %v2896_v40 }
  0xb7   :  { %1774 = vst.msk [vmem:[%s5195_s3 + $0x10] sm:$0xff] %vm1771_vm8, %v3085_v11  ;;  %v3105_v59 = vadd.f32 1.0, %v2339_v6  ;;  %v3107_v22 = vadd.f32 1.0, %v2341_v18  ;;  %2348 = vpow2.f32 %v2280_v39  ;;  %v2249_v63 = vmul.f32 -1.442695, %v3075_v60 }
  0xb8   :  { %v1025_v26 = vsel %vm3090_vm14, %v2335_v38, %v1021_v20  ;;  %2350 = vpow2.f32 %v2233_v5  ;;  %v989_v40 = vsub.f32 1.0, %v2919_v57  ;;  %v1266_v7 = vand.u32 2147483647, %v3082_v62 }
  0xb9   :  { %v2343_v15 = vpop.eup %2342  ;;  %v1030_v12 = vsel %vm1027_vm15, %v1029_v16, %v1025_v26  ;;  %v1268_v13 = vand.u32 2147483648, %v3082_v62  ;;  %2352 = vrcp.f32 %v3105_v59  ;;  %v1508_v17 = vand.u32 2147483648, %v3105_v59 }
  0xba   :  { %v2345_v52 = vpop.eup %2344  ;;  %v3117_v8 = vmul.f32 %v1030_v12, %v2892_v37  ;;  %2354 = vrcp.f32 %v3107_v22  ;;  %vm1262_vm0 = vweird.f32 %v3082_v62  ;;  %v1506_v57 = vand.u32 2147483647, %v3105_v59 }
  0xbb   :  { %2356 = vrcp.f32 %v3098_v29  ;;  %v3124_v33 = vadd.f32 1.0, %v2343_v15  ;;  %v801_v37 = vand.u32 2147483647, %v3107_v22  ;;  %v803_v36 = vand.u32 2147483648, %v3107_v22 }
  0xbc   :  { %v2347_v35 = vpop.eup %2346  ;;  %1790 = vst.msk [vmem:[%s5195_s3 + $0x90] sm:$0xff] %vm1771_vm8, %v3117_v8  ;;  %v3133_v38 = vadd.f32 1.0, %v2345_v52  ;;  %2358 = vpow2.f32 %v2249_v63  ;;  %vm3136_vm1 = vcmp.eq.f32.partialorder %v1266_v7, 8.507059e+37  ;;  %v1269_v46 = vor.u32 1.1754944e-38, %v1268_v13 }
  0xbd   :  { %v2349_v41 = vpop.eup %2348  ;;  %v1258_v24 = vmul.f32 %v2347_v35, %v3082_v62  ;;  %vm1502_vm2 = vweird.f32 %v3105_v59  ;;  %v990_v1 = vmul.f32 %v2901_v43, %v989_v40  ;;  %v1509_v47 = vor.u32 1.1754944e-38, %v1508_v17 }
  0xbe   :  { %v2351_v27 = vpop.eup %2350  ;;  %vm797_vm4 = vweird.f32 %v3107_v22  ;;  %2360 = vrcp.f32 %v3124_v33  ;;  %v1043_v48 = vand.u32 2147483648, %v3124_v33  ;;  %vm1263_vm5 = vweird.f32 %v2347_v35 }
  0xbf   :  { %v2353_v50 = vpop.eup %2352  ;;  %v1259_v51 = vsub.f32 1.0, %v1258_v24  ;;  %v1041_v53 = vand.u32 2147483647, %v3124_v33  ;;  %2362 = vrcp.f32 %v3133_v38  ;;  %vm3148_vm3 = vcmp.eq.f32.partialorder %v1506_v57, 8.507059e+37  ;;  %vm1264_vm13 = vmor %vm1262_vm0, %vm1263_vm5 }
  0xc0   :  { %v2355_v55 = vpop.eup %2354  ;;  %v1498_v42 = vmul.f32 %v2353_v50, %v3105_v59  ;;  %vm3152_vm6 = vcmp.eq.f32.partialorder %v801_v37, 8.507059e+37  ;;  %v804_v6 = vor.u32 1.1754944e-38, %v803_v36  ;;  %vm1037_vm7 = vweird.f32 %v3124_v33 }
  0xc1   :  { %v3157_v9 = vpop.eup %2356  ;;  %v1260_v16 = vmul.f32 %v2347_v35, %v1259_v51  ;;  %vm1503_vm9 = vweird.f32 %v2353_v50  ;;  %v793_v39 = vmul.f32 %v2355_v55, %v3107_v22  ;;  %v1281_v5 = vand.u32 2147483647, %v3133_v38 }
  0xc2   :  { %v2359_v18 = vpop.eup %2358  ;;  %v1499_v20 = vsub.f32 1.0, %v1498_v42  ;;  %v3161_v26 = vor.u32 1.1754944e-38, %v1043_v48  ;;  %vm1277_vm10 = vweird.f32 %v3133_v38  ;;  %v1283_v63 = vand.u32 2147483648, %v3133_v38 }
  0xc3   :  { %v3165_v40 = vadd.f32 1.0, %v2349_v41  ;;  %v1261_v15 = vadd.f32 %v2347_v35, %v1260_v16  ;;  %v794_v12 = vsub.f32 1.0, %v793_v39  ;;  %vm798_vm11 = vweird.f32 %v2355_v55 }
  0xc4   :  { %vm3167_vm12 = vcmp.eq.f32.partialorder %v1041_v53, 8.507059e+37  ;;  %v3171_v13 = vadd.f32 1.0, %v2351_v27  ;;  %v2361_v52 = vpop.eup %2360  ;;  %v1500_v17 = vmul.f32 %v2353_v50, %v1499_v20  ;;  %v3177_v57 = vadd.f32 1.0, %v2359_v18  ;;  %vm3188_vm14 = vmor %vm797_vm4, %vm798_vm11 }
  0xc5   :  { %2364 = vrcp.f32 %v3165_v40  ;;  %v3180_v37 = vadd.f32 %v2901_v43, %v990_v1  ;;  %v2363_v36 = vpop.eup %2362  ;;  %v1265_v41 = vsel %vm1264_vm13, %v2347_v35, %v1261_v15  ;;  %v795_v24 = vmul.f32 %v2355_v55, %v794_v12  ;;  %v3280_v35 = vpop.f32.mrf.mxu0 }
  0xc6   :  { %v1033_v48 = vmul.f32 %v2361_v52, %v3124_v33  ;;  %v1284_v27 = vor.u32 1.1754944e-38, %v1283_v63  ;;  %v1270_v51 = vsel %vm3136_vm1, %v1269_v46, %v1265_v41  ;;  %v1501_v53 = vadd.f32 %v2353_v50, %v1500_v17  ;;  %vm1504_vm1 = vmor %vm1502_vm2, %vm1503_vm9 }
  0xc7   :  { %vm1038_vm15 = vweird.f32 %v2361_v52  ;;  %v1273_v1 = vmul.f32 %v2363_v36, %v3133_v38  ;;  %vm3193_vm0 = vcmp.eq.f32.partialorder %v1281_v5, 8.507059e+37  ;;  %v3198_v42 = vmul.f32 %v1270_v51, %v2929_v61 }
  0xc8   :  { %v796_v45 = vadd.f32 %v2355_v55, %v795_v24  ;;  %v1034_v22 = vsub.f32 1.0, %v1033_v48  ;;  %v1521_v46 = vand.u32 2147483647, %v3165_v40  ;;  %v1505_v16 = vsel %vm1504_vm1, %v2353_v50, %v1501_v53  ;;  %vm3224_vm4 = vmor %vm1037_vm7, %vm1038_vm15  ;;  %v407_v24 = vpop.f32.mrf.mxu2 }
  0xc9   :  { %v1274_v39 = vsub.f32 1.0, %v1273_v1  ;;  %v1523_v18 = vand.u32 2147483648, %v3165_v40  ;;  %2366 = vrcp.f32 %v3171_v13  ;;  %1806 = vst.msk [vmem:[%s5195_s3 + $0x110] sm:$0xff] %vm1771_vm8, %v3198_v42  ;;  %v1510_v61 = vsel %vm3148_vm3, %v1509_v47, %v1505_v16 }
  0xca   :  { %v800_v59 = vsel %vm3188_vm14, %v2355_v55, %v796_v45  ;;  %v1035_v5 = vmul.f32 %v2361_v52, %v1034_v22  ;;  %vm1517_vm2 = vweird.f32 %v3165_v40  ;;  %v3217_v20 = vmul.f32 %v1510_v61, %v2936_v2  ;;  %v455_v22 = vpop.f32.mrf.mxu3 }
  0xcb   :  { %v2365_v50 = vpop.eup %2364  ;;  %v805_v63 = vsel %vm3152_vm6, %v804_v6, %v800_v59  ;;  %v1275_v47 = vmul.f32 %v2363_v36, %v1274_v39  ;;  %vm1278_vm5 = vweird.f32 %v2363_v36  ;;  %vm3232_vm3 = vcmp.eq.f32.partialorder %v1521_v46, 8.507059e+37 }
  0xcc   :  { %v3229_v55 = vmul.f32 %v805_v63, %v2961_v30  ;;  %v1036_v25 = vadd.f32 %v2361_v52, %v1035_v5  ;;  %v1513_v12 = vmul.f32 %v2365_v50, %v3165_v40  ;;  %v1524_v10 = vor.u32 1.1754944e-38, %v1523_v18  ;;  %1822 = vst.msk [vmem:[%s5195_s3 + $0x190] sm:$0xff] %vm1771_vm8, %v3217_v20  ;;  %vm1279_vm9 = vmor %vm1277_vm10, %vm1278_vm5 }
  0xcd   :  { %v1276_v33 = vadd.f32 %v2363_v36, %v1275_v47  ;;  %vm1518_vm6 = vweird.f32 %v2365_v50  ;;  %vm812_vm7 = vweird.f32 %v3171_v13  ;;  %v816_v30 = vand.u32 2147483647, %v3171_v13 }
  0xce   :  { %1775 = vst.msk [vmem:[%s5195_s3 + $0x18] sm:$0xff] %vm1771_vm8, %v3229_v55  ;;  %v1040_v6 = vsel %vm3224_vm4, %v2361_v52, %v1036_v25  ;;  %v1514_v17 = vsub.f32 1.0, %v1513_v12  ;;  %v818_v41 = vand.u32 2147483648, %v3171_v13  ;;  %2368 = vrcp.f32 %v3177_v57  ;;  %vm1519_vm15 = vmor %vm1517_vm2, %vm1518_vm6 }
  0xcf   :  { %v2367_v48 = vpop.eup %2366  ;;  %v1045_v51 = vsel %vm3167_vm12, %v3161_v26, %v1040_v6  ;;  %v1280_v53 = vsel %vm1279_vm9, %v2363_v36, %v1276_v33  ;;  %vm3257_vm11 = vcmp.eq.f32.partialorder %v816_v30, 8.507059e+37  ;;  %vm1052_vm13 = vweird.f32 %v3177_v57  ;;  %v362_v33 = vpop.f32.mrf.mxu1 }
  0xd0   :  { %v3263_v38 = vmul.f32 %v1045_v51, %v3047_v23  ;;  %v1285_v52 = vsel %vm3193_vm0, %v1284_v27, %v1280_v53  ;;  %v1515_v1 = vmul.f32 %v2365_v50, %v1514_v17  ;;  %v808_v45 = vmul.f32 %v2367_v48, %v3171_v13  ;;  %v410_v17 = vpop.f32.mrf.mxu2 }
  0xd1   :  { %v3269_v7 = vmul.f32 %v1285_v52, %v3050_v44  ;;  %vm813_vm10 = vweird.f32 %v2367_v48  ;;  %v1056_v26 = vand.u32 2147483647, %v3177_v57  ;;  %v1058_v36 = vand.u32 2147483648, %v3177_v57 }
  0xd2   :  { %1791 = vst.msk [vmem:[%s5195_s3 + $0x98] sm:$0xff] %vm1771_vm8, %v3263_v38  ;;  %v1516_v23 = vadd.f32 %v2365_v50, %v1515_v1  ;;  %v809_v27 = vsub.f32 1.0, %v808_v45  ;;  %vm992_vm12 = vweird.f32 %v2866_v21  ;;  %vm993_vm14 = vweird.f32 %v2901_v43  ;;  %vm3307_vm2 = vmor %vm812_vm7, %vm813_vm10 }
  0xd3   :  { %1807 = vst.msk [vmem:[%s5195_s3 + $0x118] sm:$0xff] %vm1771_vm8, %v3269_v7  ;;  %v819_v44 = vor.u32 1.1754944e-38, %v818_v41  ;;  %vm3290_vm0 = vcmp.eq.f32.partialorder %v1056_v26, 8.507059e+37  ;;  %v996_v16 = vand.u32 2147483647, %v2866_v21  ;;  %v998_v39 = vand.u32 2147483648, %v2866_v21  ;;  %vm3296_vm1 = vmor %vm992_vm12, %vm993_vm14  ;;  %v458_v41 = vpop.f32.mrf.mxu3  ;;  %v317_v26 = vpop.f32.mrf.mxu0 }
  0xd4   :  { %v2369_v18 = vpop.eup %2368  ;;  %v1520_v61 = vsel %vm1519_vm15, %v2365_v50, %v1516_v23  ;;  %v810_v59 = vmul.f32 %v2367_v48, %v809_v27  ;;  %v1059_v5 = vor.u32 1.1754944e-38, %v1058_v36  ;;  %v748_v40 = vmul.f32 %v2908_v49, %v2877_v28 }
  0xd5   :  { %v1525_v15 = vsel %vm3232_vm3, %v1524_v10, %v1520_v61  ;;  %v1048_v21 = vmul.f32 %v2369_v18, %v3177_v57  ;;  %vm1053_vm4 = vweird.f32 %v2369_v18  ;;  %v995_v50 = vsel %vm3296_vm1, %v2901_v43, %v3180_v37 }
  0xd6   :  { %v3317_v25 = vmul.f32 %v1525_v15, %v3069_v54  ;;  %v811_v12 = vadd.f32 %v2367_v48, %v810_v59  ;;  %v999_v2 = vor.u32 1.1754944e-38, %v998_v39  ;;  %v749_v10 = vsub.f32 1.0, %v748_v40  ;;  %vm3340_vm7 = vmor %vm1052_vm13, %vm1053_vm4 }
  0xd7   :  { %v1049_v13 = vsub.f32 1.0, %v1048_v21  ;;  %vm997_vm5 = vcmp.eq.f32.partialorder %v996_v16, 8.507059e+37  ;;  %vm753_vm3 = vweird.f32 %v2908_v49  ;;  %v756_v30 = vand.u32 2147483647, %v2877_v28 }
  0xd8   :  { %1823 = vst.msk [vmem:[%s5195_s3 + $0x198] sm:$0xff] %vm1771_vm8, %v3317_v25  ;;  %v815_v43 = vsel %vm3307_vm2, %v2367_v48, %v811_v12  ;;  %v1000_v54 = vsel %vm997_vm5, %v999_v2, %v995_v50  ;;  %v750_v37 = vmul.f32 %v2908_v49, %v749_v10  ;;  %v758_v6 = vand.u32 2147483648, %v2877_v28  ;;  %v413_v40 = vpop.f32.mrf.mxu2 }
  0xd9   :  { %v820_v51 = vsel %vm3257_vm11, %v819_v44, %v815_v43  ;;  %v1050_v53 = vmul.f32 %v2369_v18, %v1049_v13  ;;  %v1723_v52 = vmul.f32 %v1000_v54, %v2846_v4  ;;  %vm752_vm6 = vweird.f32 %v2877_v28 }
  0xda   :  { %v3335_v1 = vmul.f32 %v820_v51, %v3072_v56  ;;  %v751_v45 = vadd.f32 %v2908_v49, %v750_v37  ;;  %vm3345_vm9 = vcmp.eq.f32.partialorder %v756_v30, 8.507059e+37  ;;  %v3350_v4 = vadd.f32 %v2840_v0, %v407_v24  ;;  %vm754_vm11 = vmor %vm752_vm6, %vm753_vm3 }
  0xdb   :  { %v1051_v28 = vadd.f32 %v2369_v18, %v1050_v53  ;;  %1932 = vrot.lane.b32.xlu1 %v1723_v52, %s2556_s10  ;;  %1788 = vst.msk [vmem:[%s5195_s3 + $0x80] sm:$0xff] %vm1771_vm8, %v1723_v52  ;;  %v759_v56 = vor.u32 1.1754944e-38, %v758_v6  ;;  %v3360_v57 = vadd.f32 %v2840_v0, %v455_v22  ;;  %v1228_v24 = vmul.f32 %v3157_v9, %v3098_v29  ;;  %v461_v21 = vpop.f32.mrf.mxu3 }
  0xdc   :  { %1776 = vst.msk [vmem:[%s5195_s3 + $0x20] sm:$0xff] %vm1771_vm8, %v3335_v1  ;;  %v755_v36 = vsel %vm754_vm11, %v2908_v49, %v751_v45  ;;  %v2265_v23 = vmul.f32 -1.442695, %v3350_v4  ;;  %vm1232_vm13 = vweird.f32 %v3098_v29  ;;  %vm1233_vm10 = vweird.f32 %v3157_v9 }
  0xdd   :  { %v1055_v22 = vsel %vm3340_vm7, %v2369_v18, %v1051_v28  ;;  %v760_v27 = vsel %vm3345_vm9, %v759_v56, %v755_v36  ;;  %v2281_v44 = vmul.f32 -1.442695, %v3360_v57  ;;  %v1229_v16 = vsub.f32 1.0, %v1228_v24  ;;  %vm1234_vm12 = vmor %vm1232_vm13, %vm1233_vm10 }
  0xde   :  { %v1060_v39 = vsel %vm3290_vm0, %v1059_v5, %v1055_v22  ;;  %v1707_v49 = vmul.f32 %v760_v27, %v2843_v3  ;;  %2370 = vpow2.f32 %v2265_v23  ;;  %v1236_v61 = vand.u32 2147483647, %v3098_v29  ;;  %v365_v5 = vpop.f32.mrf.mxu1 }
  0xdf   :  { %v3383_v59 = vmul.f32 %v1060_v39, %v3075_v60  ;;  %2372 = vpow2.f32 %v2281_v44  ;;  %v1230_v18 = vmul.f32 %v3157_v9, %v1229_v16  ;;  %v1238_v63 = vand.u32 2147483648, %v3098_v29 }
  0xe0   :  { %1900 = vrot.lane.b32.xlu0 %v1707_v49, %s2556_s10  ;;  %1772 = vst.msk [vmem:[%s5195_s3] sm:$0xff] %vm1771_vm8, %v1707_v49  ;;  %v3394_v3 = vadd.f32 %v2840_v0, %v3280_v35  ;;  %v3397_v46 = vadd.f32 %v2840_v0, %v362_v33  ;;  %v3400_v60 = vadd.f32 %v2840_v0, %v410_v17  ;;  %vm1237_vm14 = vcmp.eq.f32.partialorder %v1236_v61, 8.507059e+37  ;;  %v320_v17 = vpop.f32.mrf.mxu0 }
  0xe1   :  { %1792 = vst.msk [vmem:[%s5195_s3 + $0xa0] sm:$0xff] %vm1771_vm8, %v3383_v59  ;;  %v1231_v15 = vadd.f32 %v3157_v9, %v1230_v18  ;;  %v1239_v47 = vor.u32 1.1754944e-38, %v1238_v63  ;;  %v3409_v35 = vadd.f32 %v2840_v0, %v458_v41  ;;  %v3419_v10 = vadd.f32 %v2840_v0, %v317_v26  ;;  %v416_v26 = vpop.f32.mrf.mxu2 }
  0xe2   :  { %v2234_v50 = vmul.f32 -1.442695, %v3394_v3  ;;  %v2250_v12 = vmul.f32 -1.442695, %v3397_v46  ;;  %v2266_v2 = vmul.f32 -1.442695, %v3400_v60  ;;  %v3425_v29 = vadd.f32 %v2840_v0, %v365_v5 }
  0xe3   :  { %v1235_v33 = vsel %vm1234_vm12, %v3157_v9, %v1231_v15  ;;  %1998 = vrot.lane.b32.xlu1 %v3063_v34, %s2556_s10  ;;  %v2282_v6 = vmul.f32 -1.442695, %v3409_v35  ;;  %v2235_v34 = vmul.f32 -1.442695, %v3419_v10  ;;  %v3435_v41 = vadd.f32 %v2840_v0, %v413_v40  ;;  %v464_v22 = vpop.f32.mrf.mxu3 }
  0xe4   :  { %v2371_v13 = vpop.eup %2370  ;;  %v1240_v30 = vsel %vm1237_vm14, %v1239_v47, %v1235_v33  ;;  %2374 = vpow2.f32 %v2234_v50  ;;  %v2251_v53 = vmul.f32 -1.442695, %v3425_v29  ;;  %v3452_v52 = vadd.f32 %v2840_v0, %v320_v17 }
  0xe5   :  { %v2373_v43 = vpop.eup %2372  ;;  %v3427_v54 = vadd.f32 1.0, %v2371_v13  ;;  %v1739_v37 = vmul.f32 %v1240_v30, %v2860_v14  ;;  %2376 = vpow2.f32 %v2250_v12  ;;  %v3444_v14 = vadd.f32 %v2840_v0, %v461_v21 }
  0xe6   :  { %v3431_v9 = vadd.f32 1.0, %v2373_v43  ;;  %2378 = vpow2.f32 %v2266_v2  ;;  %v2267_v56 = vmul.f32 -1.442695, %v3435_v41  ;;  %v368_v24 = vpop.f32.mrf.mxu1  ;;  %v3468_v39 = vmul.f32 -1.442695, %v3452_v52 }
  0xe7   :  { %2380 = vrcp.f32 %v3427_v54  ;;  %1964 = vrot.lane.b32.xlu2 %v1739_v37, %s2556_s10  ;;  %1804 = vst.msk [vmem:[%s5195_s3 + $0x100] sm:$0xff] %vm1771_vm8, %v1739_v37  ;;  %v1298_v51 = vand.u32 2147483648, %v3427_v54  ;;  %v1296_v28 = vand.u32 2147483647, %v3427_v54  ;;  %vm1292_vm15 = vweird.f32 %v3427_v54 }
  0xe8   :  { %2382 = vrcp.f32 %v3431_v9  ;;  %1996 = vrot.lane.b32.xlu0 %v2984_v58, %s2556_s10  ;;  %v1536_v48 = vand.u32 2147483647, %v3431_v9  ;;  %v1538_v45 = vand.u32 2147483648, %v3431_v9  ;;  %vm1532_vm0 = vweird.f32 %v3431_v9 }
  0xe9   :  { %2384 = vpow2.f32 %v2282_v6  ;;  %v2283_v23 = vmul.f32 -1.442695, %v3444_v14  ;;  %v1299_v44 = vor.u32 1.1754944e-38, %v1298_v51  ;;  %v3476_v63 = vadd.f32 %v2840_v0, %v368_v24 }
  0xea   :  { %v2375_v62 = vpop.eup %2374  ;;  %2386 = vpow2.f32 %v2235_v34  ;;  %vm3470_vm1 = vcmp.eq.f32.partialorder %v1536_v48, 8.507059e+37  ;;  %v1539_v18 = vor.u32 1.1754944e-38, %v1538_v45  ;;  %vm3482_vm2 = vcmp.eq.f32.partialorder %v1296_v28, 8.507059e+37  ;;  %v3730_v34 = vld [vmem:[%s5194_s2] ss:$0 sm:$0xff] }
  0xeb   :  { %v2377_v36 = vpop.eup %2376  ;;  %v3460_v58 = vadd.f32 1.0, %v2375_v62  ;;  %1904 = vrot.lane.b32.xlu1 %v3085_v11, %s2556_s10  ;;  %2388 = vpow2.f32 %v2251_v53  ;;  %v3479_v11 = vadd.f32 %v2840_v0, %v416_v26  ;;  %v3489_v21 = vadd.f32 %v2840_v0, %v464_v22 }
  0xec   :  { %v2379_v27 = vpop.eup %2378  ;;  %v3465_v16 = vadd.f32 1.0, %v2377_v36 }
  0xed   :  { %v2381_v49 = vpop.eup %2380  ;;  %2390 = vrcp.f32 %v3460_v58  ;;  %v831_v47 = vand.u32 2147483647, %v3460_v58  ;;  %vm827_vm4 = vweird.f32 %v3460_v58  ;;  %v833_v2 = vand.u32 2147483648, %v3460_v58 }
  0xee   :  { %v2383_v5 = vpop.eup %2382  ;;  %v1288_v40 = vmul.f32 %v2381_v49, %v3427_v54  ;;  %2392 = vrcp.f32 %v3465_v16  ;;  %vm1293_vm5 = vweird.f32 %v2381_v49  ;;  %v1071_v30 = vand.u32 2147483647, %v3465_v16 }
  0xef   :  { %v2385_v50 = vpop.eup %2384  ;;  %v1528_v12 = vmul.f32 %v2383_v5, %v3431_v9  ;;  %1934 = vrot.lane.b32.xlu2 %v3016_v32, %s2556_s10  ;;  %2394 = vpow2.f32 %v2267_v56  ;;  %v3497_v43 = vadd.f32 1.0, %v2379_v27  ;;  %vm1533_vm3 = vweird.f32 %v2383_v5  ;;  %vm1294_vm13 = vmor %vm1292_vm15, %vm1293_vm5 }
  0xf0   :  { %v2387_v33 = vpop.eup %2386  ;;  %v1289_v13 = vsub.f32 1.0, %v1288_v40  ;;  %1902 = vrot.lane.b32.xlu0 %v3011_v19, %s2556_s10  ;;  %v1073_v37 = vand.u32 2147483648, %v3465_v16  ;;  %v3502_v6 = vadd.f32 1.0, %v2385_v50  ;;  %vm3506_vm6 = vcmp.eq.f32.partialorder %v831_v47, 8.507059e+37  ;;  %vm3519_vm9 = vmor %vm1532_vm0, %vm1533_vm3 }
  0xf1   :  { %v1529_v0 = vsub.f32 1.0, %v1528_v12  ;;  %v3504_v17 = vpop.eup %2388  ;;  %vm1067_vm7 = vweird.f32 %v3465_v16  ;;  %2396 = vrcp.f32 %v3497_v43  ;;  %v834_v19 = vor.u32 1.1754944e-38, %v833_v2 }
  0xf2   :  { %v1290_v32 = vmul.f32 %v2381_v49, %v1289_v13  ;;  %v3512_v48 = vadd.f32 1.0, %v2387_v33  ;;  %2398 = vpow2.f32 %v2283_v23  ;;  %vm3524_vm11 = vcmp.eq.f32.partialorder %v1071_v30, 8.507059e+37 }
  0xf3   :  { %v2391_v51 = vpop.eup %2390  ;;  %v1530_v53 = vmul.f32 %v2383_v5, %v1529_v0  ;;  %1968 = vrot.lane.b32.xlu1 %v3198_v42, %s2556_s10  ;;  %2400 = vrcp.f32 %v3502_v6  ;;  %v1074_v36 = vor.u32 1.1754944e-38, %v1073_v37  ;;  %v1311_v23 = vand.u32 2147483647, %v3497_v43 }
  0xf4   :  { %v2393_v45 = vpop.eup %2392  ;;  %v1291_v62 = vadd.f32 %v2381_v49, %v1290_v32  ;;  %v823_v56 = vmul.f32 %v2391_v51, %v3460_v58  ;;  %vm828_vm10 = vweird.f32 %v2391_v51  ;;  %vm1307_vm12 = vweird.f32 %v3497_v43 }
  0xf5   :  { %v2395_v26 = vpop.eup %2394  ;;  %v1531_v42 = vadd.f32 %v2383_v5, %v1530_v53  ;;  %v1063_v9 = vmul.f32 %v2393_v45, %v3465_v16  ;;  %vm1068_vm14 = vweird.f32 %v2393_v45  ;;  %v1313_v33 = vand.u32 2147483648, %v3497_v43  ;;  %vm3555_vm15 = vmor %vm827_vm4, %vm828_vm10 }
  0xf6   :  { %v1295_v22 = vsel %vm1294_vm13, %v2381_v49, %v1291_v62  ;;  %v824_v27 = vsub.f32 1.0, %v823_v56  ;;  %vm3560_vm0 = vcmp.eq.f32.partialorder %v1311_v23, 8.507059e+37  ;;  %v1551_v58 = vand.u32 2147483647, %v3502_v6 }
  0xf7   :  { %v1300_v40 = vsel %vm3482_vm2, %v1299_v44, %v1295_v22  ;;  %v1535_v47 = vsel %vm3519_vm9, %v2383_v5, %v1531_v42  ;;  %v1064_v50 = vsub.f32 1.0, %v1063_v9  ;;  %2000 = vrot.lane.b32.xlu2 %v3217_v20, %s2556_s10  ;;  %v2397_v54 = vpop.eup %2396  ;;  %v1553_v13 = vand.u32 2147483648, %v3502_v6 }
  0xf8   :  { %v3542_v12 = vmul.f32 %v1300_v40, %v3350_v4  ;;  %v1540_v49 = vsel %vm3470_vm1, %v1539_v18, %v1535_v47  ;;  %v825_v2 = vmul.f32 %v2391_v51, %v824_v27  ;;  %1966 = vrot.lane.b32.xlu0 %v3038_v31, %s2556_s10  ;;  %v2399_v44 = vpop.eup %2398  ;;  %v1303_v61 = vmul.f32 %v2397_v54, %v3497_v43  ;;  %vm3572_vm1 = vmor %vm1067_vm7, %vm1068_vm14 }
  0xf9   :  { %v3550_v5 = vmul.f32 %v1540_v49, %v3360_v57  ;;  %v1065_v4 = vmul.f32 %v2393_v45, %v1064_v50  ;;  %v2401_v15 = vpop.eup %2400  ;;  %2402 = vrcp.f32 %v3512_v48  ;;  %vm1308_vm2 = vweird.f32 %v2397_v54 }
  0xfa   :  { %1808 = vst.msk [vmem:[%s5195_s3 + $0x120] sm:$0xff] %vm1771_vm8, %v3542_v12  ;;  %v826_v31 = vadd.f32 %v2391_v51, %v825_v2  ;;  %v1304_v0 = vsub.f32 1.0, %v1303_v61  ;;  %v1543_v16 = vmul.f32 %v2401_v15, %v3502_v6  ;;  %v1314_v32 = vor.u32 1.1754944e-38, %v1313_v33  ;;  %vm3601_vm3 = vmor %vm1307_vm12, %vm1308_vm2 }
  0xfb   :  { %1824 = vst.msk [vmem:[%s5195_s3 + $0x1a0] sm:$0xff] %vm1771_vm8, %v3550_v5  ;;  %v1066_v30 = vadd.f32 %v2393_v45, %v1065_v4  ;;  %1906 = vrot.lane.b32.xlu1 %v3229_v55, %s2556_s10  ;;  %vm1547_vm4 = vweird.f32 %v3502_v6  ;;  %vm1548_vm5 = vweird.f32 %v2401_v15  ;;  %vm3605_vm7 = vcmp.eq.f32.partialorder %v1551_v58, 8.507059e+37 }
  0xfc   :  { %v830_v37 = vsel %vm3555_vm15, %v2391_v51, %v826_v31  ;;  %v1305_v28 = vmul.f32 %v2397_v54, %v1304_v0  ;;  %v1544_v56 = vsub.f32 1.0, %v1543_v16  ;;  %v3613_v23 = vadd.f32 1.0, %v3504_v17 }
  0xfd   :  { %v835_v53 = vsel %vm3506_vm6, %v834_v19, %v830_v37  ;;  %v1070_v62 = vsel %vm3572_vm1, %v2393_v45, %v1066_v30  ;;  %v1554_v19 = vor.u32 1.1754944e-38, %v1553_v13  ;;  %vm3625_vm6 = vmor %vm1547_vm4, %vm1548_vm5  ;;  %vm842_vm9 = vweird.f32 %v3512_v48 }
  0xfe   :  { %v3595_v42 = vmul.f32 %v835_v53, %v3394_v3  ;;  %v1075_v55 = vsel %vm3524_vm11, %v1074_v36, %v1070_v62  ;;  %v1306_v9 = vadd.f32 %v2397_v54, %v1305_v28  ;;  %v1545_v3 = vmul.f32 %v2401_v15, %v1544_v56 }
  0xff   :  { %v3610_v45 = vmul.f32 %v1075_v55, %v3397_v46  ;;  %1970 = vrot.lane.b32.xlu2 %v3269_v7, %s2556_s10  ;;  %v2403_v43 = vpop.eup %2402  ;;  %v846_v17 = vand.u32 2147483647, %v3512_v48  ;;  %v3631_v24 = vadd.f32 1.0, %v2395_v26  ;;  %2404 = vpow2.f32 %v3468_v39 }
 0x100   :  { %1777 = vst.msk [vmem:[%s5195_s3 + $0x28] sm:$0xff] %vm1771_vm8, %v3595_v42  ;;  %1936 = vrot.lane.b32.xlu0 %v3117_v8, %s2556_s10  ;;  %v1310_v7 = vsel %vm3601_vm3, %v2397_v54, %v1306_v9  ;;  %v1546_v6 = vadd.f32 %v2401_v15, %v1545_v3  ;;  %v838_v36 = vmul.f32 %v2403_v43, %v3512_v48  ;;  %v848_v26 = vand.u32 2147483648, %v3512_v48 }
 0x101   :  { %1793 = vst.msk [vmem:[%s5195_s3 + $0xa8] sm:$0xff] %vm1771_vm8, %v3610_v45  ;;  %v1315_v39 = vsel %vm3560_vm0, %v1314_v32, %v1310_v7  ;;  %vm843_vm11 = vweird.f32 %v2403_v43  ;;  %2406 = vrcp.f32 %v3613_v23  ;;  %v3648_v8 = vadd.f32 1.0, %v2399_v44 }
 0x102   :  { %v3651_v22 = vmul.f32 %v1315_v39, %v3400_v60  ;;  %v1550_v27 = vsel %vm3625_vm6, %v2401_v15, %v1546_v6  ;;  %v839_v40 = vsub.f32 1.0, %v838_v36  ;;  %v1086_v47 = vand.u32 2147483647, %v3613_v23  ;;  %vm3679_vm10 = vmor %vm842_vm9, %vm843_vm11  ;;  %v371_v39 = vpop.f32.mrf.mxu1 }
 0x103   :  { %1938 = vrot.lane.b32.xlu1 %v3263_v38, %s2556_s10  ;;  %v1555_v50 = vsel %vm3605_vm7, %v1554_v19, %v1550_v27  ;;  %v1088_v54 = vand.u32 2147483648, %v3613_v23  ;;  %2408 = vrcp.f32 %v3631_v24  ;;  %v2252_v49 = vmul.f32 -1.442695, %v3476_v63 }
 0x104   :  { %1809 = vst.msk [vmem:[%s5195_s3 + $0x128] sm:$0xff] %vm1771_vm8, %v3651_v22  ;;  %v3669_v60 = vmul.f32 %v1555_v50, %v3409_v35  ;;  %v840_v2 = vmul.f32 %v2403_v43, %v839_v40  ;;  %vm3671_vm13 = vcmp.eq.f32.partialorder %v846_v17, 8.507059e+37  ;;  %v1326_v33 = vand.u32 2147483647, %v3631_v24 }
 0x105   :  { %v2405_v44 = vpop.eup %2404  ;;  %v849_v4 = vor.u32 1.1754944e-38, %v848_v26  ;;  %vm1082_vm12 = vweird.f32 %v3613_v23  ;;  %2410 = vrcp.f32 %v3648_v8  ;;  %v2268_v35 = vmul.f32 -1.442695, %v3479_v11 }
 0x106   :  { %1825 = vst.msk [vmem:[%s5195_s3 + $0x1a8] sm:$0xff] %vm1771_vm8, %v3669_v60  ;;  %v841_v61 = vadd.f32 %v2403_v43, %v840_v2  ;;  %vm3691_vm14 = vcmp.eq.f32.partialorder %v1086_v47, 8.507059e+37  ;;  %vm1322_vm15 = vweird.f32 %v3631_v24  ;;  %v3696_v18 = vadd.f32 1.0, %v2405_v44 }
 0x107   :  { %1908 = vrot.lane.b32.xlu2 %v3335_v1, %s2556_s10  ;;  %v2407_v15 = vpop.eup %2406  ;;  %v1089_v31 = vor.u32 1.1754944e-38, %v1088_v54  ;;  %v1328_v57 = vand.u32 2147483648, %v3631_v24  ;;  %v1566_v58 = vand.u32 2147483647, %v3648_v8  ;;  %2412 = vpow2.f32 %v2252_v49  ;;  %v323_v1 = vpop.f32.mrf.mxu0 }
 0x108   :  { %2002 = vrot.lane.b32.xlu0 %v3317_v25, %s2556_s10  ;;  %v845_v13 = vsel %vm3679_vm10, %v2403_v43, %v841_v61  ;;  %v1078_v30 = vmul.f32 %v2407_v15, %v3613_v23  ;;  %vm3707_vm0 = vcmp.eq.f32.partialorder %v1326_v33, 8.507059e+37  ;;  %vm1562_vm1 = vweird.f32 %v3648_v8 }
 0x109   :  { %v2409_v16 = vpop.eup %2408  ;;  %v850_v37 = vsel %vm3671_vm13, %v849_v4, %v845_v13  ;;  %v1568_v32 = vand.u32 2147483648, %v3648_v8  ;;  %2414 = vrcp.f32 %v3696_v18  ;;  %v2284_v25 = vmul.f32 -1.442695, %v3489_v21  ;;  %v467_v13 = vpop.f32.mrf.mxu3 }
 0x10a   :  { %v3718_v53 = vmul.f32 %v850_v37, %v3419_v10  ;;  %v1079_v62 = vsub.f32 1.0, %v1078_v30  ;;  %vm1083_vm2 = vweird.f32 %v2407_v15  ;;  %v1318_v28 = vmul.f32 %v2409_v16, %v3631_v24 }
 0x10b   :  { %2004 = vrot.lane.b32.xlu1 %v3550_v5, %s2556_s10  ;;  %v2411_v56 = vpop.eup %2410  ;;  %v1329_v55 = vor.u32 1.1754944e-38, %v1328_v57  ;;  %vm3723_vm4 = vcmp.eq.f32.partialorder %v1566_v58, 8.507059e+37  ;;  %2416 = vpow2.f32 %v2268_v35  ;;  %v3733_v10 = vadd.f32 %v3730_v34, %v323_v1  ;;  %vm3744_vm3 = vmor %vm1082_vm12, %vm1083_vm2 }
 0x10c   :  { %1778 = vst.msk [vmem:[%s5195_s3 + $0x30] sm:$0xff] %vm1771_vm8, %v3718_v53  ;;  %v1080_v5 = vmul.f32 %v2407_v15, %v1079_v62  ;;  %v1319_v19 = vsub.f32 1.0, %v1318_v28  ;;  %vm1323_vm5 = vweird.f32 %v2409_v16  ;;  %v1558_v9 = vmul.f32 %v2411_v56, %v3648_v8 }
 0x10d   :  { %v2413_v3 = vpop.eup %2412  ;;  %vm1563_vm7 = vweird.f32 %v2411_v56  ;;  %v1569_v46 = vor.u32 1.1754944e-38, %v1568_v32  ;;  %2418 = vpow2.f32 %v2284_v25  ;;  %v2237_v17 = vmul.f32 -1.442695, %v3733_v10  ;;  %vm3756_vm6 = vmor %vm1322_vm15, %vm1323_vm5 }
 0x10e   :  { %v1081_v7 = vadd.f32 %v2407_v15, %v1080_v5  ;;  %v1320_v6 = vmul.f32 %v2409_v16, %v1319_v19  ;;  %v1559_v36 = vsub.f32 1.0, %v1558_v9  ;;  %v3749_v26 = vadd.f32 1.0, %v2413_v3  ;;  %vm3773_vm11 = vmor %vm1562_vm1, %vm1563_vm7 }
 0x10f   :  { %1940 = vrot.lane.b32.xlu2 %v3383_v59, %s2556_s10  ;;  %v2415_v27 = vpop.eup %2414  ;;  %vm857_vm9 = vweird.f32 %v3696_v18  ;;  %v861_v40 = vand.u32 2147483647, %v3696_v18  ;;  %v863_v47 = vand.u32 2147483648, %v3696_v18  ;;  %2420 = vpow2.f32 %v2237_v17  ;;  %v326_v51 = vpop.f32.mrf.mxu0 }
 0x110   :  { %1972 = vrot.lane.b32.xlu0 %v3542_v12, %s2556_s10  ;;  %v1085_v59 = vsel %vm3744_vm3, %v2407_v15, %v1081_v7  ;;  %v1321_v50 = vadd.f32 %v2409_v16, %v1320_v6  ;;  %v1560_v54 = vmul.f32 %v2411_v56, %v1559_v36  ;;  %v853_v24 = vmul.f32 %v2415_v27, %v3696_v18 }
 0x111   :  { %v2417_v49 = vpop.eup %2416  ;;  %v1090_v2 = vsel %vm3691_vm14, %v1089_v31, %v1085_v59  ;;  %vm858_vm13 = vweird.f32 %v2415_v27  ;;  %2422 = vrcp.f32 %v3749_v26  ;;  %v3779_v12 = vadd.f32 %v3730_v34, %v371_v39  ;;  %v419_v31 = vpop.f32.mrf.mxu2 }
 0x112   :  { %v1729_v33 = vmul.f32 %v1090_v2, %v3425_v29  ;;  %v1325_v44 = vsel %vm3756_vm6, %v2409_v16, %v1321_v50  ;;  %v1561_v20 = vadd.f32 %v2411_v56, %v1560_v54  ;;  %v854_v4 = vsub.f32 1.0, %v853_v24  ;;  %vm3808_vm10 = vmor %vm857_vm9, %vm858_vm13  ;;  %v374_v50 = vpop.f32.mrf.mxu1 }
 0x113   :  { %1974 = vrot.lane.b32.xlu1 %v3651_v22, %s2556_s10  ;;  %v2419_v8 = vpop.eup %2418  ;;  %v1330_v35 = vsel %vm3707_vm0, %v1329_v55, %v1325_v44  ;;  %v1101_v61 = vand.u32 2147483647, %v3749_v26  ;;  %v1103_v48 = vand.u32 2147483648, %v3749_v26  ;;  %v3790_v15 = vadd.f32 1.0, %v2417_v49 }
 0x114   :  { %1794 = vst.msk [vmem:[%s5195_s3 + $0xb0] sm:$0xff] %vm1771_vm8, %v1729_v33  ;;  %v3797_v29 = vmul.f32 %v1330_v35, %v3435_v41  ;;  %v1565_v22 = vsel %vm3773_vm11, %v2411_v56, %v1561_v20  ;;  %v855_v57 = vmul.f32 %v2415_v27, %v854_v4  ;;  %v3801_v58 = vadd.f32 1.0, %v2419_v8 }
 0x115   :  { %v2421_v30 = vpop.eup %2420  ;;  %v1570_v0 = vsel %vm3723_vm4, %v1569_v46, %v1565_v22  ;;  %vm3812_vm12 = vcmp.eq.f32.partialorder %v861_v40, 8.507059e+37  ;;  %v864_v16 = vor.u32 1.1754944e-38, %v863_v47  ;;  %2424 = vrcp.f32 %v3790_v15 }
 0x116   :  { %1810 = vst.msk [vmem:[%s5195_s3 + $0x130] sm:$0xff] %vm1771_vm8, %v3797_v29  ;;  %v3823_v37 = vmul.f32 %v1570_v0, %v3444_v14  ;;  %v856_v18 = vadd.f32 %v2415_v27, %v855_v57  ;;  %v2253_v32 = vmul.f32 -1.442695, %v3779_v12  ;;  %v3827_v25 = vadd.f32 %v3730_v34, %v419_v31 }
 0x117   :  { %1910 = vrot.lane.b32.xlu2 %v3595_v42, %s2556_s10  ;;  %v2423_v62 = vpop.eup %2422  ;;  %vm1097_vm14 = vweird.f32 %v3749_v26  ;;  %vm3832_vm15 = vcmp.eq.f32.partialorder %v1101_v61, 8.507059e+37  ;;  %2426 = vrcp.f32 %v3801_v58  ;;  %v3838_v14 = vadd.f32 %v3730_v34, %v467_v13 }
 0x118   :  { %1942 = vrot.lane.b32.xlu0 %v3610_v45, %s2556_s10  ;;  %1826 = vst.msk [vmem:[%s5195_s3 + $0x1b0] sm:$0xff] %vm1771_vm8, %v3823_v37  ;;  %v860_v42 = vsel %vm3808_vm10, %v2415_v27, %v856_v18  ;;  %v1093_v56 = vmul.f32 %v2423_v62, %v3749_v26  ;;  %v1104_v55 = vor.u32 1.1754944e-38, %v1103_v48  ;;  %vm1337_vm0 = vweird.f32 %v3790_v15 }
 0x119   :  { %v865_v5 = vsel %vm3812_vm12, %v864_v16, %v860_v42  ;;  %vm1098_vm1 = vweird.f32 %v2423_v62  ;;  %v1341_v45 = vand.u32 2147483647, %v3790_v15  ;;  %v1343_v19 = vand.u32 2147483648, %v3790_v15  ;;  %v422_v41 = vpop.f32.mrf.mxu2 }
 0x11a   :  { %v1714_v9 = vmul.f32 %v865_v5, %v3452_v52  ;;  %v1094_v3 = vsub.f32 1.0, %v1093_v56  ;;  %v3856_v43 = vadd.f32 1.0, %v2421_v30  ;;  %2428 = vpow2.f32 %v2253_v32  ;;  %vm3875_vm4 = vmor %vm1097_vm14, %vm1098_vm1 }
 0x11b   :  { %1944 = vrot.lane.b32.xlu1 %v1729_v33, %s2556_s10  ;;  %v2425_v46 = vpop.eup %2424  ;;  %v1581_v17 = vand.u32 2147483647, %v3801_v58  ;;  %v2269_v7 = vmul.f32 -1.442695, %v3827_v25  ;;  %v2285_v6 = vmul.f32 -1.442695, %v3838_v14  ;;  %v3863_v36 = vadd.f32 %v3730_v34, %v326_v51 }
 0x11c   :  { %1779 = vst.msk [vmem:[%s5195_s3 + $0x38] sm:$0xff] %vm1771_vm8, %v1714_v9  ;;  %v1095_v52 = vmul.f32 %v2423_v62, %v1094_v3  ;;  %v1333_v39 = vmul.f32 %v2425_v46, %v3790_v15  ;;  %vm1577_vm2 = vweird.f32 %v3801_v58  ;;  %2430 = vrcp.f32 %v3856_v43 }
 0x11d   :  { %v2427_v27 = vpop.eup %2426  ;;  %vm3879_vm5 = vcmp.eq.f32.partialorder %v1341_v45, 8.507059e+37  ;;  %v1344_v47 = vor.u32 1.1754944e-38, %v1343_v19  ;;  %v1583_v59 = vand.u32 2147483648, %v3801_v58  ;;  %2432 = vpow2.f32 %v2269_v7 }
 0x11e   :  { %v1096_v54 = vadd.f32 %v2423_v62, %v1095_v52  ;;  %v1334_v24 = vsub.f32 1.0, %v1333_v39  ;;  %vm1338_vm3 = vweird.f32 %v2425_v46  ;;  %v1573_v49 = vmul.f32 %v2427_v27, %v3801_v58 }
 0x11f   :  { %2006 = vrot.lane.b32.xlu2 %v3669_v60, %s2556_s10  ;;  %vm1578_vm7 = vweird.f32 %v2427_v27  ;;  %vm3887_vm6 = vcmp.eq.f32.partialorder %v1581_v17, 8.507059e+37  ;;  %2434 = vpow2.f32 %v2285_v6  ;;  %v2238_v2 = vmul.f32 -1.442695, %v3863_v36  ;;  %vm3903_vm9 = vmor %vm1337_vm0, %vm1338_vm3 }
 0x120   :  { %1912 = vrot.lane.b32.xlu0 %v3718_v53, %s2556_s10  ;;  %v2429_v38 = vpop.eup %2428  ;;  %v1100_v33 = vsel %vm3875_vm4, %v2423_v62, %v1096_v54  ;;  %v1335_v44 = vmul.f32 %v2425_v46, %v1334_v24  ;;  %v1574_v20 = vsub.f32 1.0, %v1573_v49  ;;  %v3897_v4 = vadd.f32 %v3730_v34, %v374_v50  ;;  %vm3917_vm11 = vmor %vm1577_vm2, %vm1578_vm7 }
 0x121   :  { %v1105_v60 = vsel %vm3832_vm15, %v1104_v55, %v1100_v33  ;;  %v1584_v35 = vor.u32 1.1754944e-38, %v1583_v59  ;;  %v3907_v53 = vadd.f32 1.0, %v2429_v38  ;;  %2436 = vpow2.f32 %v2238_v2 }
 0x122   :  { %v2431_v61 = vpop.eup %2430  ;;  %v3910_v48 = vmul.f32 %v1105_v60, %v3476_v63  ;;  %v1336_v31 = vadd.f32 %v2425_v46, %v1335_v44  ;;  %v1575_v22 = vmul.f32 %v2427_v27, %v1574_v20  ;;  %v2254_v57 = vmul.f32 -1.442695, %v3897_v4  ;;  %v329_v60 = vpop.f32.mrf.mxu0 }
 0x123   :  { %1914 = vrot.lane.b32.xlu1 %v1714_v9, %s2556_s10  ;;  %v2433_v13 = vpop.eup %2432  ;;  %v868_v30 = vmul.f32 %v2431_v61, %v3856_v43  ;;  %vm872_vm13 = vweird.f32 %v3856_v43  ;;  %v876_v63 = vand.u32 2147483647, %v3856_v43  ;;  %2438 = vrcp.f32 %v3907_v53 }
 0x124   :  { %1795 = vst.msk [vmem:[%s5195_s3 + $0xb8] sm:$0xff] %vm1771_vm8, %v3910_v48  ;;  %v1340_v58 = vsel %vm3903_vm9, %v2425_v46, %v1336_v31  ;;  %v1576_v0 = vadd.f32 %v2427_v27, %v1575_v22  ;;  %vm873_vm10 = vweird.f32 %v2431_v61  ;;  %v878_v1 = vand.u32 2147483648, %v3856_v43 }
 0x125   :  { %v2435_v16 = vpop.eup %2434  ;;  %v1345_v18 = vsel %vm3879_vm5, %v1344_v47, %v1340_v58  ;;  %v869_v32 = vsub.f32 1.0, %v868_v30  ;;  %v1116_v62 = vand.u32 2147483647, %v3907_v53  ;;  %v3936_v28 = vadd.f32 1.0, %v2433_v13  ;;  %vm3960_vm12 = vmor %vm872_vm13, %vm873_vm10 }
 0x126   :  { %v1746_v42 = vmul.f32 %v1345_v18, %v3479_v11  ;;  %v1580_v56 = vsel %vm3917_vm11, %v2427_v27, %v1576_v0  ;;  %v1118_v55 = vand.u32 2147483648, %v3907_v53  ;;  %2440 = vpow2.f32 %v2254_v57  ;;  %v470_v27 = vpop.f32.mrf.mxu3 }
 0x127   :  { %1976 = vrot.lane.b32.xlu2 %v3797_v29, %s2556_s10  ;;  %v2437_v51 = vpop.eup %2436  ;;  %v1585_v5 = vsel %vm3887_vm6, %v1584_v35, %v1580_v56  ;;  %v870_v45 = vmul.f32 %v2431_v61, %v869_v32  ;;  %2442 = vrcp.f32 %v3936_v28  ;;  %v3948_v19 = vadd.f32 %v3730_v34, %v422_v41 }
 0x128   :  { %2008 = vrot.lane.b32.xlu0 %v3823_v37, %s2556_s10  ;;  %1811 = vst.msk [vmem:[%s5195_s3 + $0x138] sm:$0xff] %vm1771_vm8, %v1746_v42  ;;  %v1762_v11 = vmul.f32 %v1585_v5, %v3489_v21  ;;  %vm3964_vm14 = vcmp.eq.f32.partialorder %v876_v63, 8.507059e+37  ;;  %v879_v3 = vor.u32 1.1754944e-38, %v878_v1  ;;  %v3968_v37 = vadd.f32 1.0, %v2435_v16  ;;  %v377_v1 = vpop.f32.mrf.mxu1 }
 0x129   :  { %v2439_v46 = vpop.eup %2438  ;;  %v871_v17 = vadd.f32 %v2431_v61, %v870_v45  ;;  %vm1112_vm15 = vweird.f32 %v3907_v53  ;;  %vm3971_vm0 = vcmp.eq.f32.partialorder %v1116_v62, 8.507059e+37  ;;  %v3975_v43 = vadd.f32 1.0, %v2437_v51 }
 0x12a   :  { %1827 = vst.msk [vmem:[%s5195_s3 + $0x1b8] sm:$0xff] %vm1771_vm8, %v1762_v11  ;;  %v1108_v7 = vmul.f32 %v2439_v46, %v3907_v53  ;;  %v1119_v6 = vor.u32 1.1754944e-38, %v1118_v55  ;;  %v1356_v52 = vand.u32 2147483647, %v3936_v28  ;;  %v1358_v39 = vand.u32 2147483648, %v3936_v28 }
 0x12b   :  { %2010 = vrot.lane.b32.xlu1 %v1762_v11, %s2556_s10  ;;  %v875_v23 = vsel %vm3960_vm12, %v2431_v61, %v871_v17  ;;  %vm1113_vm1 = vweird.f32 %v2439_v46  ;;  %2444 = vrcp.f32 %v3968_v37  ;;  %v2270_v40 = vmul.f32 -1.442695, %v3948_v19 }
 0x12c   :  { %v2441_v47 = vpop.eup %2440  ;;  %v880_v59 = vsel %vm3964_vm14, %v879_v3, %v875_v23  ;;  %v1109_v50 = vsub.f32 1.0, %v1108_v7  ;;  %v1596_v54 = vand.u32 2147483647, %v3968_v37  ;;  %2446 = vrcp.f32 %v3975_v43  ;;  %vm4013_vm5 = vmor %vm1112_vm15, %vm1113_vm1 }
 0x12d   :  { %v2443_v24 = vpop.eup %2442  ;;  %v1715_v49 = vmul.f32 %v880_v59, %v3733_v10  ;;  %vm1352_vm2 = vweird.f32 %v3936_v28  ;;  %v1598_v26 = vand.u32 2147483648, %v3968_v37  ;;  %v3997_v2 = vadd.f32 %v3730_v34, %v470_v27  ;;  %v425_v27 = vpop.f32.mrf.mxu2 }
 0x12e   :  { %v1110_v38 = vmul.f32 %v2439_v46, %v1109_v50  ;;  %v1348_v33 = vmul.f32 %v2443_v24, %v3936_v28  ;;  %vm4000_vm4 = vcmp.eq.f32.partialorder %v1356_v52, 8.507059e+37  ;;  %v1359_v20 = vor.u32 1.1754944e-38, %v1358_v39 }
 0x12f   :  { %1946 = vrot.lane.b32.xlu2 %v3910_v48, %s2556_s10  ;;  %1780 = vst.msk [vmem:[%s5195_s3 + $0x40] sm:$0xff] %vm1771_vm8, %v1715_v49  ;;  %vm1592_vm3 = vweird.f32 %v3968_v37  ;;  %v891_v8 = vand.u32 2147483647, %v3975_v43  ;;  %v4019_v35 = vadd.f32 1.0, %v2441_v47  ;;  %2448 = vpow2.f32 %v2270_v40 }
 0x130   :  { %1978 = vrot.lane.b32.xlu0 %v1746_v42, %s2556_s10  ;;  %v1111_v61 = vadd.f32 %v2439_v46, %v1110_v38  ;;  %v1349_v48 = vsub.f32 1.0, %v1348_v33  ;;  %vm1353_vm7 = vweird.f32 %v2443_v24  ;;  %vm4022_vm6 = vcmp.eq.f32.partialorder %v1596_v54, 8.507059e+37  ;;  %v380_v44 = vpop.f32.mrf.mxu1 }
 0x131   :  { %vm887_vm9 = vweird.f32 %v3975_v43  ;;  %v2445_v53 = vpop.eup %2444  ;;  %v1599_v22 = vor.u32 1.1754944e-38, %v1598_v26  ;;  %2450 = vrcp.f32 %v4019_v35  ;;  %v2286_v57 = vmul.f32 -1.442695, %v3997_v2  ;;  %vm4041_vm11 = vmor %vm1352_vm2, %vm1353_vm7 }
 0x132   :  { %v4030_v13 = vadd.f32 %v3730_v34, %v329_v60  ;;  %v2447_v15 = vpop.eup %2446  ;;  %v1115_v30 = vsel %vm4013_vm5, %v2439_v46, %v1111_v61  ;;  %v1350_v63 = vmul.f32 %v2443_v24, %v1349_v48  ;;  %v1588_v58 = vmul.f32 %v2445_v53, %v3968_v37 }
 0x133   :  { %v893_v0 = vand.u32 2147483648, %v3975_v43  ;;  %v1120_v41 = vsel %vm3971_vm0, %v1119_v6, %v1115_v30  ;;  %vm1593_vm13 = vweird.f32 %v2445_v53  ;;  %v883_v18 = vmul.f32 %v2447_v15, %v3975_v43 }
 0x134   :  { %vm4046_vm10 = vcmp.eq.f32.partialorder %v891_v8, 8.507059e+37  ;;  %v1731_v62 = vmul.f32 %v1120_v41, %v3779_v12  ;;  %v1351_v42 = vadd.f32 %v2443_v24, %v1350_v63  ;;  %v1589_v56 = vsub.f32 1.0, %v1588_v58  ;;  %vm4069_vm14 = vmor %vm1592_vm3, %vm1593_vm13 }
 0x135   :  { %vm888_vm12 = vweird.f32 %v2447_v15  ;;  %v2449_v55 = vpop.eup %2448  ;;  %v884_v51 = vsub.f32 1.0, %v883_v18  ;;  %2452 = vpow2.f32 %v2286_v57  ;;  %v2239_v28 = vmul.f32 -1.442695, %v4030_v13 }
 0x136   :  { %v4053_v5 = vadd.f32 %v3730_v34, %v377_v1  ;;  %1796 = vst.msk [vmem:[%s5195_s3 + $0xc0] sm:$0xff] %vm1771_vm8, %v1731_v62  ;;  %v1355_v45 = vsel %vm4041_vm11, %v2443_v24, %v1351_v42  ;;  %v1590_v12 = vmul.f32 %v2445_v53, %v1589_v56  ;;  %v894_v11 = vor.u32 1.1754944e-38, %v893_v0  ;;  %vm4079_vm15 = vmor %vm887_vm9, %vm888_vm12  ;;  %v332_v24 = vpop.f32.mrf.mxu0 }
 0x137   :  { %v4061_v29 = vadd.f32 1.0, %v2449_v55  ;;  %1916 = vrot.lane.b32.xlu2 %v1715_v49, %s2556_s10  ;;  %v2451_v9 = vpop.eup %2450  ;;  %v1360_v3 = vsel %vm4000_vm4, %v1359_v20, %v1355_v45  ;;  %v885_v17 = vmul.f32 %v2447_v15, %v884_v51  ;;  %2454 = vpow2.f32 %v2239_v28 }
 0x138   :  { %v2255_v21 = vmul.f32 -1.442695, %v4053_v5  ;;  %1948 = vrot.lane.b32.xlu0 %v1731_v62, %s2556_s10  ;;  %v1747_v7 = vmul.f32 %v1360_v3, %v3827_v25  ;;  %v1591_v6 = vadd.f32 %v2445_v53, %v1590_v12  ;;  %v1123_v37 = vmul.f32 %v2451_v9, %v4019_v35 }
 0x139   :  { %v1131_v39 = vand.u32 2147483647, %v4019_v35  ;;  %v886_v23 = vadd.f32 %v2447_v15, %v885_v17  ;;  %vm1127_vm0 = vweird.f32 %v4019_v35  ;;  %v1133_v40 = vand.u32 2147483648, %v4019_v35 }
 0x13a   :  { %2456 = vrcp.f32 %v4061_v29  ;;  %1812 = vst.msk [vmem:[%s5195_s3 + $0x140] sm:$0xff] %vm1771_vm8, %v1747_v7  ;;  %v1595_v25 = vsel %vm4069_vm14, %v2445_v53, %v1591_v6  ;;  %v1124_v43 = vsub.f32 1.0, %v1123_v37  ;;  %vm1128_vm1 = vweird.f32 %v2451_v9  ;;  %1980 = vrot.lane.b32.xlu1 %v1747_v7, %s2556_s10  ;;  %v473_v53 = vpop.f32.mrf.mxu3 }
 0x13b   :  { %2458 = vpow2.f32 %v2255_v21  ;;  %v2453_v47 = vpop.eup %2452  ;;  %v1600_v59 = vsel %vm4022_vm6, %v1599_v22, %v1595_v25  ;;  %v890_v50 = vsel %vm4079_vm15, %v2447_v15, %v886_v23  ;;  %v4100_v54 = vadd.f32 %v3730_v34, %v425_v27  ;;  %vm4113_vm4 = vmor %vm1127_vm0, %vm1128_vm1 }
 0x13c   :  { %v1763_v49 = vmul.f32 %v1600_v59, %v3838_v14  ;;  %v895_v26 = vsel %vm4046_vm10, %v894_v11, %v890_v50  ;;  %v1125_v38 = vmul.f32 %v2451_v9, %v1124_v43  ;;  %vm4105_vm2 = vcmp.eq.f32.partialorder %v1131_v39, 8.507059e+37 }
 0x13d   :  { %v2455_v20 = vpop.eup %2454  ;;  %v1716_v60 = vmul.f32 %v895_v26, %v3863_v36  ;;  %v1134_v14 = vor.u32 1.1754944e-38, %v1133_v40  ;;  %v1371_v8 = vand.u32 2147483647, %v4061_v29  ;;  %v4118_v61 = vadd.f32 1.0, %v2453_v47 }
 0x13e   :  { %1828 = vst.msk [vmem:[%s5195_s3 + $0x1c0] sm:$0xff] %vm1771_vm8, %v1763_v49  ;;  %v1126_v48 = vadd.f32 %v2451_v9, %v1125_v38  ;;  %v1373_v36 = vand.u32 2147483648, %v4061_v29  ;;  %v4125_v31 = vadd.f32 1.0, %v2455_v20  ;;  %v2271_v35 = vmul.f32 -1.442695, %v4100_v54  ;;  %v335_v17 = vpop.f32.mrf.mxu0 }
 0x13f   :  { %2012 = vrot.lane.b32.xlu2 %v1763_v49, %s2556_s10  ;;  %1781 = vst.msk [vmem:[%s5195_s3 + $0x48] sm:$0xff] %vm1771_vm8, %v1716_v60  ;;  %2460 = vrcp.f32 %v4118_v61  ;;  %v1611_v57 = vand.u32 2147483647, %v4118_v61  ;;  %v4136_v15 = vadd.f32 %v3730_v34, %v332_v24  ;;  %v4139_v30 = vadd.f32 %v3730_v34, %v380_v44 }
 0x140   :  { %v2457_v22 = vpop.eup %2456  ;;  %1918 = vrot.lane.b32.xlu0 %v1716_v60, %s2556_s10  ;;  %v1130_v58 = vsel %vm4113_vm4, %v2451_v9, %v1126_v48  ;;  %v1613_v1 = vand.u32 2147483648, %v4118_v61  ;;  %2462 = vrcp.f32 %v4125_v31  ;;  %vm1367_vm5 = vweird.f32 %v4061_v29 }
 0x141   :  { %v2459_v63 = vpop.eup %2458  ;;  %v1363_v0 = vmul.f32 %v2457_v22, %v4061_v29  ;;  %v1135_v41 = vsel %vm4105_vm2, %v1134_v14, %v1130_v58  ;;  %vm4150_vm3 = vcmp.eq.f32.partialorder %v1371_v8, 8.507059e+37  ;;  %v4155_v18 = vadd.f32 %v3730_v34, %v473_v53  ;;  %v428_v29 = vpop.f32.mrf.mxu2 }
 0x142   :  { %v1732_v32 = vmul.f32 %v1135_v41, %v3897_v4  ;;  %vm1368_vm7 = vweird.f32 %v2457_v22  ;;  %v1374_v42 = vor.u32 1.1754944e-38, %v1373_v36  ;;  %vm1607_vm6 = vweird.f32 %v4118_v61  ;;  %v476_v38 = vpop.f32.mrf.mxu3 }
 0x143   :  { %v1364_v62 = vsub.f32 1.0, %v1363_v0  ;;  %v4159_v56 = vadd.f32 1.0, %v2459_v63  ;;  %2464 = vpow2.f32 %v2271_v35  ;;  %v2240_v55 = vmul.f32 -1.442695, %v4136_v15  ;;  %vm4175_vm13 = vmor %vm1367_vm5, %vm1368_vm7  ;;  %v383_v0 = vpop.f32.mrf.mxu1 }
 0x144   :  { %1797 = vst.msk [vmem:[%s5195_s3 + $0xc8] sm:$0xff] %vm1771_vm8, %v1732_v32  ;;  %vm4166_vm9 = vcmp.eq.f32.partialorder %v1611_v57, 8.507059e+37  ;;  %v1614_v4 = vor.u32 1.1754944e-38, %v1613_v1  ;;  %vm902_vm11 = vweird.f32 %v4125_v31  ;;  %v2256_v45 = vmul.f32 -1.442695, %v4139_v30  ;;  %1950 = vrot.lane.b32.xlu1 %v1732_v32, %s2556_s10 }
 0x145   :  { %v1365_v51 = vmul.f32 %v2457_v22, %v1364_v62  ;;  %v2461_v12 = vpop.eup %2460  ;;  %v906_v9 = vand.u32 2147483647, %v4125_v31  ;;  %v908_v3 = vand.u32 2147483648, %v4125_v31  ;;  %2466 = vrcp.f32 %v4159_v56 }
 0x146   :  { %v2287_v46 = vmul.f32 -1.442695, %v4155_v18  ;;  %v2463_v21 = vpop.eup %2462  ;;  %v1603_v6 = vmul.f32 %v2461_v12, %v4118_v61  ;;  %v1146_v52 = vand.u32 2147483647, %v4159_v56  ;;  %2468 = vpow2.f32 %v2240_v55 }
 0x147   :  { %v1366_v7 = vadd.f32 %v2457_v22, %v1365_v51  ;;  %vm1608_vm10 = vweird.f32 %v2461_v12  ;;  %v898_v37 = vmul.f32 %v2463_v21, %v4125_v31  ;;  %vm903_vm12 = vweird.f32 %v2463_v21 }
 0x148   :  { %v1148_v39 = vand.u32 2147483648, %v4159_v56  ;;  %v1604_v23 = vsub.f32 1.0, %v1603_v6  ;;  %2470 = vpow2.f32 %v2256_v45  ;;  %v4190_v40 = vadd.f32 %v3730_v34, %v335_v17  ;;  %vm4207_vm15 = vmor %vm1607_vm6, %vm1608_vm10 }
 0x149   :  { %v1370_v27 = vsel %vm4175_vm13, %v2457_v22, %v1366_v7  ;;  %v2465_v25 = vpop.eup %2464  ;;  %v899_v47 = vsub.f32 1.0, %v898_v37  ;;  %2472 = vpow2.f32 %v2287_v46  ;;  %v4195_v59 = vadd.f32 %v3730_v34, %v428_v29  ;;  %vm4220_vm1 = vmor %vm902_vm11, %vm903_vm12 }
 0x14a   :  { %v1375_v43 = vsel %vm4150_vm3, %v1374_v42, %v1370_v27  ;;  %v1605_v24 = vmul.f32 %v2461_v12, %v1604_v23  ;;  %vm4198_vm14 = vcmp.eq.f32.partialorder %v906_v9, 8.507059e+37  ;;  %v4202_v26 = vadd.f32 1.0, %v2465_v25 }
 0x14b   :  { %v1748_v50 = vmul.f32 %v1375_v43, %v3948_v19  ;;  %v2467_v33 = vpop.eup %2466  ;;  %v900_v20 = vmul.f32 %v2463_v21, %v899_v47  ;;  %v909_v60 = vor.u32 1.1754944e-38, %v908_v3  ;;  %vm1142_vm0 = vweird.f32 %v4159_v56 }
 0x14c   :  { %v2241_v19 = vmul.f32 -1.442695, %v4190_v40  ;;  %v2469_v10 = vpop.eup %2468  ;;  %v1606_v14 = vadd.f32 %v2461_v12, %v1605_v24  ;;  %v1138_v61 = vmul.f32 %v2467_v33, %v4159_v56  ;;  %vm4225_vm2 = vcmp.eq.f32.partialorder %v1146_v52, 8.507059e+37 }
 0x14d   :  { %1813 = vst.msk [vmem:[%s5195_s3 + $0x148] sm:$0xff] %vm1771_vm8, %v1748_v50  ;;  %2474 = vrcp.f32 %v4202_v26  ;;  %1982 = vrot.lane.b32.xlu2 %v1748_v50, %s2556_s10  ;;  %v901_v36 = vadd.f32 %v2463_v21, %v900_v20  ;;  %v1149_v35 = vor.u32 1.1754944e-38, %v1148_v39  ;;  %v2272_v53 = vmul.f32 -1.442695, %v4195_v59 }
 0x14e   :  { %v4233_v31 = vadd.f32 %v3730_v34, %v476_v38  ;;  %v2471_v22 = vpop.eup %2470  ;;  %v1610_v57 = vsel %vm4207_vm15, %v2461_v12, %v1606_v14  ;;  %v1139_v63 = vsub.f32 1.0, %v1138_v61  ;;  %vm1143_vm4 = vweird.f32 %v2467_v33 }
 0x14f   :  { %v4237_v58 = vadd.f32 1.0, %v2469_v10  ;;  %v2473_v1 = vpop.eup %2472  ;;  %v1615_v41 = vsel %vm4166_vm9, %v1614_v4, %v1610_v57  ;;  %v905_v16 = vsel %vm4220_vm1, %v2463_v21, %v901_v36  ;;  %v1386_v32 = vand.u32 2147483647, %v4202_v26  ;;  %vm4251_vm5 = vmor %vm1142_vm0, %vm1143_vm4 }
 0x150   :  { %2476 = vpow2.f32 %v2241_v19  ;;  %v1764_v62 = vmul.f32 %v1615_v41, %v3997_v2  ;;  %v910_v42 = vsel %vm4198_vm14, %v909_v60, %v905_v16  ;;  %v1140_v55 = vmul.f32 %v2467_v33, %v1139_v63 }
 0x151   :  { %2478 = vrcp.f32 %v4237_v58  ;;  %v1717_v51 = vmul.f32 %v910_v42, %v4030_v13  ;;  %vm1382_vm3 = vweird.f32 %v4202_v26  ;;  %v1388_v4 = vand.u32 2147483648, %v4202_v26  ;;  %v338_v42 = vpop.f32.mrf.mxu0 }
 0x152   :  { %v4258_v2 = vadd.f32 %v3730_v34, %v383_v0  ;;  %1829 = vst.msk [vmem:[%s5195_s3 + $0x1c8] sm:$0xff] %vm1771_vm8, %v1764_v62  ;;  %v1141_v13 = vadd.f32 %v2467_v33, %v1140_v55  ;;  %v4264_v12 = vadd.f32 1.0, %v2471_v22  ;;  %v4266_v56 = vadd.f32 1.0, %v2473_v1  ;;  %2014 = vrot.lane.b32.xlu0 %v1764_v62, %s2556_s10  ;;  %v431_v1 = vpop.f32.mrf.mxu2 }
 0x153   :  { %v2475_v45 = vpop.eup %2474  ;;  %2480 = vpow2.f32 %v2272_v53  ;;  %1782 = vst.msk [vmem:[%s5195_s3 + $0x50] sm:$0xff] %vm1771_vm8, %v1717_v51  ;;  %vm4274_vm7 = vcmp.eq.f32.partialorder %v1386_v32, 8.507059e+37  ;;  %v921_v3 = vand.u32 2147483647, %v4237_v58  ;;  %v923_v46 = vand.u32 2147483648, %v4237_v58  ;;  %1920 = vrot.lane.b32.xlu1 %v1717_v51, %s2556_s10 }
 0x154   :  { %v1378_v11 = vmul.f32 %v2475_v45, %v4202_v26  ;;  %v1145_v17 = vsel %vm4251_vm5, %v2467_v33, %v1141_v13  ;;  %vm1383_vm6 = vweird.f32 %v2475_v45  ;;  %2482 = vrcp.f32 %v4264_v12 }
 0x155   :  { %v1161_v21 = vand.u32 2147483647, %v4264_v12  ;;  %v1150_v6 = vsel %vm4225_vm2, %v1149_v35, %v1145_v17  ;;  %v1163_v29 = vand.u32 2147483648, %v4264_v12  ;;  %2484 = vrcp.f32 %v4266_v56  ;;  %vm4304_vm13 = vmor %vm1382_vm3, %vm1383_vm6 }
 0x156   :  { %v2477_v7 = vpop.eup %2476  ;;  %v1379_v52 = vsub.f32 1.0, %v1378_v11  ;;  %v1733_v39 = vmul.f32 %v1150_v6, %v4053_v5  ;;  %v1389_v27 = vor.u32 1.1754944e-38, %v1388_v4  ;;  %vm917_vm9 = vweird.f32 %v4237_v58  ;;  %v386_v6 = vpop.f32.mrf.mxu1 }
 0x157   :  { %v2479_v37 = vpop.eup %2478  ;;  %v1626_v23 = vand.u32 2147483647, %v4266_v56  ;;  %vm4293_vm11 = vcmp.eq.f32.partialorder %v921_v3, 8.507059e+37  ;;  %v924_v50 = vor.u32 1.1754944e-38, %v923_v46  ;;  %vm1157_vm10 = vweird.f32 %v4264_v12  ;;  %v479_v3 = vpop.f32.mrf.mxu3 }
 0x158   :  { %v1380_v25 = vmul.f32 %v2475_v45, %v1379_v52  ;;  %v913_v43 = vmul.f32 %v2479_v37, %v4237_v58  ;;  %1798 = vst.msk [vmem:[%s5195_s3 + $0xd0] sm:$0xff] %vm1771_vm8, %v1733_v39  ;;  %vm1622_vm12 = vweird.f32 %v4266_v56  ;;  %v1628_v49 = vand.u32 2147483648, %v4266_v56  ;;  %1952 = vrot.lane.b32.xlu2 %v1733_v39, %s2556_s10 }
 0x159   :  { %v2481_v24 = vpop.eup %2480  ;;  %v4311_v38 = vadd.f32 1.0, %v2477_v7  ;;  %vm918_vm14 = vweird.f32 %v2479_v37  ;;  %vm4314_vm15 = vcmp.eq.f32.partialorder %v1161_v21, 8.507059e+37  ;;  %v1164_v26 = vor.u32 1.1754944e-38, %v1163_v29  ;;  %v341_v19 = vpop.f32.mrf.mxu0 }
 0x15a   :  { %v1381_v33 = vadd.f32 %v2475_v45, %v1380_v25  ;;  %v914_v44 = vsub.f32 1.0, %v913_v43  ;;  %v2483_v60 = vpop.eup %2482  ;;  %vm4318_vm0 = vcmp.eq.f32.partialorder %v1626_v23, 8.507059e+37  ;;  %v4323_v10 = vadd.f32 1.0, %v2481_v24  ;;  %vm4336_vm1 = vmor %vm917_vm9, %vm918_vm14 }
 0x15b   :  { %2486 = vrcp.f32 %v4311_v38  ;;  %v2288_v14 = vmul.f32 -1.442695, %v4233_v31  ;;  %v2257_v8 = vmul.f32 -1.442695, %v4258_v2  ;;  %v2485_v61 = vpop.eup %2484  ;;  %v1153_v35 = vmul.f32 %v2483_v60, %v4264_v12 }
 0x15c   :  { %v1385_v48 = vsel %vm4304_vm13, %v2475_v45, %v1381_v33  ;;  %v915_v36 = vmul.f32 %v2479_v37, %v914_v44  ;;  %v936_v53 = vand.u32 2147483647, %v4311_v38  ;;  %vm1158_vm2 = vweird.f32 %v2483_v60 }
 0x15d   :  { %v1390_v22 = vsel %vm4274_vm7, %v1389_v27, %v1385_v48  ;;  %v1618_v63 = vmul.f32 %v2485_v61, %v4266_v56  ;;  %v1629_v0 = vor.u32 1.1754944e-38, %v1628_v49  ;;  %v1154_v32 = vsub.f32 1.0, %v1153_v35  ;;  %vm4363_vm6 = vmor %vm1157_vm10, %vm1158_vm2 }
 0x15e   :  { %v1749_v41 = vmul.f32 %v1390_v22, %v4100_v54  ;;  %v916_v16 = vadd.f32 %v2479_v37, %v915_v36  ;;  %v938_v62 = vand.u32 2147483648, %v4311_v38  ;;  %vm1623_vm4 = vweird.f32 %v2485_v61  ;;  %v389_v51 = vpop.f32.mrf.mxu1 }
 0x15f   :  { %v1619_v55 = vsub.f32 1.0, %v1618_v63  ;;  %vm932_vm5 = vweird.f32 %v4311_v38  ;;  %2488 = vrcp.f32 %v4323_v10  ;;  %v1155_v54 = vmul.f32 %v2483_v60, %v1154_v32  ;;  %vm4371_vm9 = vmor %vm1622_vm12, %vm1623_vm4 }
 0x160   :  { %1814 = vst.msk [vmem:[%s5195_s3 + $0x150] sm:$0xff] %vm1771_vm8, %v1749_v41  ;;  %v920_v58 = vsel %vm4336_vm1, %v2479_v37, %v916_v16  ;;  %vm4351_vm3 = vcmp.eq.f32.partialorder %v936_v53, 8.507059e+37  ;;  %vm1397_vm7 = vweird.f32 %v4323_v10  ;;  %v1401_v28 = vand.u32 2147483647, %v4323_v10  ;;  %1984 = vrot.lane.b32.xlu0 %v1749_v41, %s2556_s10  ;;  %v4438_v53 = vld [vmem:[%s5194_s2] ss:$0 sm:$0xff] }
 0x161   :  { %v2487_v4 = vpop.eup %2486  ;;  %v925_v45 = vsel %vm4293_vm11, %v924_v50, %v920_v58  ;;  %v1620_v11 = vmul.f32 %v2485_v61, %v1619_v55  ;;  %v939_v9 = vor.u32 1.1754944e-38, %v938_v62  ;;  %2490 = vpow2.f32 %v2288_v14 }
 0x162   :  { %v1718_v46 = vmul.f32 %v925_v45, %v4136_v15  ;;  %v1156_v17 = vadd.f32 %v2483_v60, %v1155_v54  ;;  %v928_v12 = vmul.f32 %v2487_v4, %v4311_v38  ;;  %v1403_v7 = vand.u32 2147483648, %v4323_v10 }
 0x163   :  { %v1621_v52 = vadd.f32 %v2485_v61, %v1620_v11  ;;  %vm933_vm11 = vweird.f32 %v2487_v4  ;;  %2492 = vpow2.f32 %v2257_v8  ;;  %v4378_v29 = vadd.f32 %v3730_v34, %v431_v1 }
 0x164   :  { %1783 = vst.msk [vmem:[%s5195_s3 + $0x58] sm:$0xff] %vm1771_vm8, %v1718_v46  ;;  %v1160_v15 = vsel %vm4363_vm6, %v2483_v60, %v1156_v17  ;;  %v929_v56 = vsub.f32 1.0, %v928_v12  ;;  %v4387_v37 = vadd.f32 %v3730_v34, %v479_v3  ;;  %v4390_v39 = vadd.f32 %v3730_v34, %v338_v42  ;;  %1922 = vrot.lane.b32.xlu2 %v1718_v46, %s2556_s10  ;;  %vm4409_vm13 = vmor %vm932_vm5, %vm933_vm11  ;;  %v1965_v42 = vpop.permute.xlu2 %1964 }
 0x165   :  { %v2489_v27 = vpop.eup %2488  ;;  %v1165_v23 = vsel %vm4314_vm15, %v1164_v26, %v1160_v15  ;;  %v1625_v25 = vsel %vm4371_vm9, %v2485_v61, %v1621_v52  ;;  %v2273_v43 = vmul.f32 -1.442695, %v4378_v29  ;;  %v4399_v47 = vadd.f32 %v3730_v34, %v386_v6  ;;  %2124 = vst.msk [vmem:[%s5196_s4 + $0x100] sm:$0xff] %vm1771_vm8, %v1965_v42 }
 0x166   :  { %v1734_v50 = vmul.f32 %v1165_v23, %v4139_v30  ;;  %v1630_v24 = vsel %vm4318_vm0, %v1629_v0, %v1625_v25  ;;  %v930_v5 = vmul.f32 %v2487_v4, %v929_v56  ;;  %v1393_v49 = vmul.f32 %v2489_v27, %v4323_v10  ;;  %v434_v30 = vpop.f32.mrf.mxu2 }
 0x167   :  { %v2491_v33 = vpop.eup %2490  ;;  %v1765_v44 = vmul.f32 %v1630_v24, %v4155_v18  ;;  %vm1398_vm10 = vweird.f32 %v2489_v27  ;;  %2494 = vpow2.f32 %v2273_v43  ;;  %v2289_v34 = vmul.f32 -1.442695, %v4387_v37 }
 0x168   :  { %1799 = vst.msk [vmem:[%s5195_s3 + $0xd8] sm:$0xff] %vm1771_vm8, %v1734_v50  ;;  %v931_v26 = vadd.f32 %v2487_v4, %v930_v5  ;;  %v1394_v60 = vsub.f32 1.0, %v1393_v49  ;;  %v4418_v18 = vadd.f32 1.0, %v2491_v33  ;;  %v2242_v38 = vmul.f32 -1.442695, %v4390_v39  ;;  %1954 = vrot.lane.b32.xlu0 %v1734_v50, %s2556_s10  ;;  %vm4448_vm14 = vmor %vm1397_vm7, %vm1398_vm10 }
 0x169   :  { %v2493_v14 = vpop.eup %2492  ;;  %1830 = vst.msk [vmem:[%s5195_s3 + $0x1d0] sm:$0xff] %vm1771_vm8, %v1765_v44  ;;  %vm4426_vm12 = vcmp.eq.f32.partialorder %v1401_v28, 8.507059e+37  ;;  %v1404_v61 = vor.u32 1.1754944e-38, %v1403_v7  ;;  %2496 = vpow2.f32 %v2289_v34  ;;  %v2258_v48 = vmul.f32 -1.442695, %v4399_v47  ;;  %2016 = vrot.lane.b32.xlu1 %v1765_v44, %s2556_s10 }
 0x16a   :  { %v935_v36 = vsel %vm4409_vm13, %v2487_v4, %v931_v26  ;;  %v1395_v35 = vmul.f32 %v2489_v27, %v1394_v60  ;;  %2498 = vrcp.f32 %v4418_v18  ;;  %v4441_v22 = vadd.f32 %v4438_v53, %v434_v30 }
 0x16b   :  { %v940_v57 = vsel %vm4351_vm3, %v939_v9, %v935_v36  ;;  %v1641_v0 = vand.u32 2147483647, %v4418_v18  ;;  %v4453_v1 = vadd.f32 1.0, %v2493_v14  ;;  %v4456_v41 = vadd.f32 %v4438_v53, %v341_v19  ;;  %v4533_v14 = vpop.f32.mrf.mxu3 }
 0x16c   :  { %v1719_v16 = vmul.f32 %v940_v57, %v4190_v40  ;;  %v1396_v32 = vadd.f32 %v2489_v27, %v1395_v35  ;;  %v1643_v62 = vand.u32 2147483648, %v4418_v18  ;;  %2500 = vpow2.f32 %v2242_v38  ;;  %v1935_v43 = vpop.permute.xlu2 %1934  ;;  %v392_v57 = vpop.f32.mrf.mxu1 }
 0x16d   :  { %v2495_v55 = vpop.eup %2494  ;;  %vm1637_vm15 = vweird.f32 %v4418_v18  ;;  %2502 = vrcp.f32 %v4453_v1  ;;  %v1176_v10 = vand.u32 2147483647, %v4453_v1  ;;  %v2274_v54 = vmul.f32 -1.442695, %v4441_v22  ;;  %2109 = vst.msk [vmem:[%s5196_s4 + $0x88] sm:$0xff] %vm1771_vm8, %v1935_v43 }
 0x16e   :  { %1784 = vst.msk [vmem:[%s5195_s3 + $0x60] sm:$0xff] %vm1771_vm8, %v1719_v16  ;;  %v1400_v40 = vsel %vm4448_vm14, %v2489_v27, %v1396_v32  ;;  %v4473_v58 = vadd.f32 1.0, %v2495_v55  ;;  %vm4478_vm0 = vcmp.eq.f32.partialorder %v1641_v0, 8.507059e+37  ;;  %2504 = vpow2.f32 %v2258_v48 }
 0x16f   :  { %v2497_v28 = vpop.eup %2496  ;;  %v1405_v4 = vsel %vm4426_vm12, %v1404_v61, %v1400_v40  ;;  %v2243_v13 = vmul.f32 -1.442695, %v4456_v41  ;;  %v1644_v3 = vor.u32 1.1754944e-38, %v1643_v62  ;;  %v1178_v46 = vand.u32 2147483648, %v4453_v1 }
 0x170   :  { %v2499_v11 = vpop.eup %2498  ;;  %v1750_v9 = vmul.f32 %v1405_v4, %v4195_v59  ;;  %2506 = vrcp.f32 %v4473_v58  ;;  %1924 = vrot.lane.b32.xlu0 %v1719_v16, %s2556_s10  ;;  %vm1172_vm1 = vweird.f32 %v4453_v1  ;;  %v1416_v21 = vand.u32 2147483647, %v4473_v58 }
 0x171   :  { %v1633_v17 = vmul.f32 %v2499_v11, %v4418_v18  ;;  %v4491_v12 = vadd.f32 %v4438_v53, %v389_v51  ;;  %vm1638_vm2 = vweird.f32 %v2499_v11  ;;  %vm4497_vm4 = vcmp.eq.f32.partialorder %v1176_v10, 8.507059e+37 }
 0x172   :  { %v2501_v7 = vpop.eup %2500  ;;  %1815 = vst.msk [vmem:[%s5195_s3 + $0x158] sm:$0xff] %vm1771_vm8, %v1750_v9  ;;  %v4501_v6 = vadd.f32 1.0, %v2497_v28  ;;  %2508 = vpow2.f32 %v2274_v54  ;;  %1986 = vrot.lane.b32.xlu1 %v1750_v9, %s2556_s10  ;;  %v1418_v56 = vand.u32 2147483648, %v4473_v58  ;;  %v1179_v25 = vor.u32 1.1754944e-38, %v1178_v46  ;;  %vm4525_vm7 = vmor %vm1637_vm15, %vm1638_vm2 }
 0x173   :  { %v2503_v52 = vpop.eup %2502  ;;  %v1634_v15 = vsub.f32 1.0, %v1633_v17  ;;  %v4505_v27 = vadd.f32 1.0, %v2501_v7  ;;  %2510 = vpow2.f32 %v2243_v13  ;;  %vm1412_vm5 = vweird.f32 %v4473_v58 }
 0x174   :  { %v1168_v23 = vmul.f32 %v2503_v52, %v4453_v1  ;;  %2512 = vrcp.f32 %v4501_v6  ;;  %v2505_v50 = vpop.eup %2504  ;;  %vm4510_vm3 = vcmp.eq.f32.partialorder %v1416_v21, 8.507059e+37  ;;  %v1656_v49 = vand.u32 2147483647, %v4501_v6  ;;  %v2001_v9 = vpop.permute.xlu2 %2000 }
 0x175   :  { %v1635_v24 = vmul.f32 %v2499_v11, %v1634_v15  ;;  %v4516_v33 = vmul.f32 -1.442695, %v4491_v12  ;;  %vm1173_vm6 = vweird.f32 %v2503_v52  ;;  %v1658_v30 = vand.u32 2147483648, %v4501_v6  ;;  %2142 = vst.msk [vmem:[%s5196_s4 + $0x190] sm:$0xff] %vm1771_vm8, %v2001_v9 }
 0x176   :  { %v2507_v44 = vpop.eup %2506  ;;  %v1169_v34 = vsub.f32 1.0, %v1168_v23  ;;  %2514 = vrcp.f32 %v4505_v27  ;;  %v1419_v38 = vor.u32 1.1754944e-38, %v1418_v56  ;;  %v951_v19 = vand.u32 2147483647, %v4505_v27  ;;  %vm4542_vm10 = vmor %vm1172_vm1, %vm1173_vm6 }
 0x177   :  { %v1636_v26 = vadd.f32 %v2499_v11, %v1635_v24  ;;  %v1408_v60 = vmul.f32 %v2507_v44, %v4473_v58  ;;  %vm1413_vm9 = vweird.f32 %v2507_v44  ;;  %vm1652_vm11 = vweird.f32 %v4501_v6 }
 0x178   :  { %v2509_v8 = vpop.eup %2508  ;;  %v1170_v18 = vmul.f32 %v2503_v52, %v1169_v34  ;;  %vm947_vm13 = vweird.f32 %v4505_v27  ;;  %vm4546_vm12 = vcmp.eq.f32.partialorder %v1656_v49, 8.507059e+37  ;;  %v4550_v63 = vadd.f32 1.0, %v2505_v50  ;;  %vm4570_vm15 = vmor %vm1412_vm5, %vm1413_vm9  ;;  %v485_v49 = vpop.f32.mrf.mxu3 }
 0x179   :  { %v2511_v61 = vpop.eup %2510  ;;  %v1640_v48 = vsel %vm4525_vm7, %v2499_v11, %v1636_v26  ;;  %v1409_v35 = vsub.f32 1.0, %v1408_v60  ;;  %v1659_v62 = vor.u32 1.1754944e-38, %v1658_v30  ;;  %v953_v42 = vand.u32 2147483648, %v4505_v27 }
 0x17a   :  { %v2513_v0 = vpop.eup %2512  ;;  %v1645_v16 = vsel %vm4478_vm0, %v1644_v3, %v1640_v48  ;;  %v1171_v32 = vadd.f32 %v2503_v52, %v1170_v18  ;;  %vm4557_vm14 = vcmp.eq.f32.partialorder %v951_v19, 8.507059e+37  ;;  %v4561_v54 = vadd.f32 1.0, %v2509_v8  ;;  %v437_v8 = vpop.f32.mrf.mxu2 }
 0x17b   :  { %v1766_v1 = vmul.f32 %v1645_v16, %v4233_v31  ;;  %v1410_v55 = vmul.f32 %v2507_v44, %v1409_v35  ;;  %v1648_v40 = vmul.f32 %v2513_v0, %v4501_v6  ;;  %vm1653_vm0 = vweird.f32 %v2513_v0  ;;  %v344_v18 = vpop.f32.mrf.mxu0 }
 0x17c   :  { %v4563_v51 = vpop.eup %2514  ;;  %v1175_v28 = vsel %vm4542_vm10, %v2503_v52, %v1171_v32  ;;  %2516 = vrcp.f32 %v4550_v63  ;;  %v4575_v31 = vadd.f32 1.0, %v2511_v61  ;;  %v1191_v46 = vand.u32 2147483647, %v4550_v63  ;;  %v1933_v52 = vpop.permute.xlu1 %1932  ;;  %vm4606_vm2 = vmor %vm1652_vm11, %vm1653_vm0 }
 0x17d   :  { %1831 = vst.msk [vmem:[%s5195_s3 + $0x1d8] sm:$0xff] %vm1771_vm8, %v1766_v1  ;;  %v1180_v45 = vsel %vm4497_vm4, %v1179_v25, %v1175_v28  ;;  %v1411_v13 = vadd.f32 %v2507_v44, %v1410_v55  ;;  %v1649_v11 = vsub.f32 1.0, %v1648_v40  ;;  %v943_v58 = vmul.f32 %v4563_v51, %v4505_v27  ;;  %2018 = vrot.lane.b32.xlu2 %v1766_v1, %s2556_s10 }
 0x17e   :  { %v1735_v3 = vmul.f32 %v1180_v45, %v4258_v2  ;;  %vm948_vm1 = vweird.f32 %v4563_v51  ;;  %v1193_v17 = vand.u32 2147483648, %v4550_v63  ;;  %2518 = vrcp.f32 %v4561_v54  ;;  %v1901_v2 = vpop.permute.xlu0 %1900  ;;  %2108 = vst.msk [vmem:[%s5196_s4 + $0x80] sm:$0xff] %vm1771_vm8, %v1933_v52 }
 0x17f   :  { %v1415_v21 = vsel %vm4570_vm15, %v2507_v44, %v1411_v13  ;;  %v1650_v7 = vmul.f32 %v2513_v0, %v1649_v11  ;;  %v944_v59 = vsub.f32 1.0, %v943_v58  ;;  %v954_v23 = vor.u32 1.1754944e-38, %v953_v42  ;;  %vm4626_vm5 = vmor %vm947_vm13, %vm948_vm1  ;;  %2092 = vst.msk [vmem:[%s5196_s4] sm:$0xff] %vm1771_vm8, %v1901_v2 }
 0x180   :  { %1800 = vst.msk [vmem:[%s5195_s3 + $0xe0] sm:$0xff] %vm1771_vm8, %v1735_v3  ;;  %v1420_v15 = vsel %vm4510_vm3, %v1419_v38, %v1415_v21  ;;  %vm1187_vm4 = vweird.f32 %v4550_v63  ;;  %v1431_v25 = vand.u32 2147483647, %v4561_v54  ;;  %1956 = vrot.lane.b32.xlu1 %v1735_v3, %s2556_s10  ;;  %v1433_v5 = vand.u32 2147483648, %v4561_v54 }
 0x181   :  { %v1751_v43 = vmul.f32 %v1420_v15, %v4378_v29  ;;  %v1651_v50 = vadd.f32 %v2513_v0, %v1650_v7  ;;  %v945_v24 = vmul.f32 %v4563_v51, %v944_v59  ;;  %vm4630_vm3 = vcmp.eq.f32.partialorder %v1191_v46, 8.507059e+37  ;;  %v488_v59 = vpop.f32.mrf.mxu3 }
 0x182   :  { %v4620_v6 = vpop.eup %2516  ;;  %v1194_v20 = vor.u32 1.1754944e-38, %v1193_v17  ;;  %vm1427_vm7 = vweird.f32 %v4561_v54  ;;  %2520 = vrcp.f32 %v4575_v31  ;;  %vm962_vm6 = vweird.f32 %v4575_v31 }
 0x183   :  { %1816 = vst.msk [vmem:[%s5195_s3 + $0x160] sm:$0xff] %vm1771_vm8, %v1751_v43  ;;  %v1655_v27 = vsel %vm4606_vm2, %v2513_v0, %v1651_v50  ;;  %v946_v34 = vadd.f32 %v4563_v51, %v945_v24  ;;  %v1183_v30 = vmul.f32 %v4620_v6, %v4550_v63  ;;  %vm1188_vm9 = vweird.f32 %v4620_v6  ;;  %v1971_v0 = vpop.permute.xlu2 %1970 }
 0x184   :  { %v1660_v26 = vsel %vm4546_vm12, %v1659_v62, %v1655_v27  ;;  %vm4653_vm11 = vcmp.eq.f32.partialorder %v1431_v25, 8.507059e+37  ;;  %v4657_v38 = vor.u32 1.1754944e-38, %v1433_v5  ;;  %v966_v19 = vand.u32 2147483647, %v4575_v31  ;;  %v4660_v61 = vpop.eup %2518  ;;  %2127 = vst.msk [vmem:[%s5196_s4 + $0x118] sm:$0xff] %vm1771_vm8, %v1971_v0  ;;  %vm4695_vm10 = vmor %vm1187_vm4, %vm1188_vm9  ;;  %v440_v5 = vpop.f32.mrf.mxu2 }
 0x185   :  { %v1767_v48 = vmul.f32 %v1660_v26, %v4387_v37  ;;  %v950_v36 = vsel %vm4626_vm5, %v4563_v51, %v946_v34  ;;  %v1184_v35 = vsub.f32 1.0, %v1183_v30  ;;  %2522 = vpow2.f32 %v4516_v33  ;;  %1988 = vrot.lane.b32.xlu2 %v1751_v43, %s2556_s10 }
 0x186   :  { %v955_v16 = vsel %vm4557_vm14, %v954_v23, %v950_v36  ;;  %v1423_v32 = vmul.f32 %v4660_v61, %v4561_v54  ;;  %vm1428_vm13 = vweird.f32 %v4660_v61  ;;  %v968_v37 = vand.u32 2147483648, %v4575_v31  ;;  %v1997_v55 = vpop.permute.xlu0 %1996  ;;  %v1999_v23 = vpop.permute.xlu1 %1998 }
 0x187   :  { %1832 = vst.msk [vmem:[%s5195_s3 + $0x1e0] sm:$0xff] %vm1771_vm8, %v1767_v48  ;;  %v1720_v33 = vmul.f32 %v955_v16, %v4390_v39  ;;  %v1185_v62 = vmul.f32 %v4620_v6, %v1184_v35  ;;  %v4685_v42 = vadd.f32 %v4438_v53, %v437_v8  ;;  %v4689_v1 = vadd.f32 %v4438_v53, %v4533_v14  ;;  %vm4732_vm14 = vmor %vm1427_vm7, %vm1428_vm13 }
 0x188   :  { %v2521_v40 = vpop.eup %2520  ;;  %v1424_v39 = vsub.f32 1.0, %v1423_v32  ;;  %v4700_v51 = vadd.f32 %v4438_v53, %v344_v18  ;;  %v4703_v28 = vadd.f32 %v4438_v53, %v392_v57  ;;  %v4706_v14 = vadd.f32 %v4438_v53, %v485_v49  ;;  %2140 = vst.msk [vmem:[%s5196_s4 + $0x180] sm:$0xff] %vm1771_vm8, %v1997_v55  ;;  %2020 = vrot.lane.b32.xlu0 %v1767_v48, %s2556_s10 }
 0x189   :  { %1785 = vst.msk [vmem:[%s5195_s3 + $0x68] sm:$0xff] %vm1771_vm8, %v1720_v33  ;;  %v1186_v63 = vadd.f32 %v4620_v6, %v1185_v62  ;;  %v958_v4 = vmul.f32 %v2521_v40, %v4575_v31  ;;  %vm963_vm12 = vweird.f32 %v2521_v40  ;;  %v2275_v45 = vmul.f32 -1.442695, %v4685_v42  ;;  %1926 = vrot.lane.b32.xlu1 %v1720_v33, %s2556_s10 }
 0x18a   :  { %v1425_v13 = vmul.f32 %v4660_v61, %v1424_v39  ;;  %v2290_v11 = vmul.f32 -1.442695, %v4689_v1  ;;  %v2244_v58 = vmul.f32 -1.442695, %v4700_v51  ;;  %v2260_v9 = vmul.f32 -1.442695, %v4703_v28  ;;  %vm4749_vm15 = vmor %vm962_vm6, %vm963_vm12 }
 0x18b   :  { %v2523_v3 = vpop.eup %2522  ;;  %v1190_v46 = vsel %vm4695_vm10, %v4620_v6, %v1186_v63  ;;  %v959_v21 = vsub.f32 1.0, %v958_v4  ;;  %2524 = vpow2.f32 %v2275_v45  ;;  %v2291_v7 = vmul.f32 -1.442695, %v4706_v14  ;;  %v1909_v25 = vpop.permute.xlu2 %1908  ;;  %2141 = vst.msk [vmem:[%s5196_s4 + $0x188] sm:$0xff] %vm1771_vm8, %v1999_v23 }
 0x18c   :  { %v1195_v52 = vsel %vm4630_vm3, %v1194_v20, %v1190_v46  ;;  %v1426_v2 = vadd.f32 %v4660_v61, %v1425_v13  ;;  %v4740_v15 = vadd.f32 1.0, %v2523_v3  ;;  %2526 = vpow2.f32 %v2290_v11  ;;  %2096 = vst.msk [vmem:[%s5196_s4 + $0x20] sm:$0xff] %vm1771_vm8, %v1909_v25 }
 0x18d   :  { %v1736_v56 = vmul.f32 %v1195_v52, %v4399_v47  ;;  %v960_v54 = vmul.f32 %v2521_v40, %v959_v21  ;;  %2528 = vpow2.f32 %v2244_v58  ;;  %v969_v24 = vor.u32 1.1754944e-38, %v968_v37 }
 0x18e   :  { %v1430_v43 = vsel %vm4732_vm14, %v4660_v61, %v1426_v2  ;;  %2530 = vrcp.f32 %v4740_v15  ;;  %v4755_v47 = vadd.f32 %v4438_v53, %v488_v59  ;;  %vm967_vm0 = vcmp.eq.f32.partialorder %v966_v19, 8.507059e+37  ;;  %v1903_v44 = vpop.permute.xlu0 %1902  ;;  %v1905_v0 = vpop.permute.xlu1 %1904 }
 0x18f   :  { %1801 = vst.msk [vmem:[%s5195_s3 + $0xe8] sm:$0xff] %vm1771_vm8, %v1736_v56  ;;  %v1435_v49 = vsel %vm4653_vm11, %v4657_v38, %v1430_v43  ;;  %v961_v6 = vadd.f32 %v2521_v40, %v960_v54  ;;  %2532 = vpow2.f32 %v2260_v9  ;;  %1958 = vrot.lane.b32.xlu2 %v1736_v56, %s2556_s10  ;;  %v1206_v34 = vand.u32 2147483647, %v4740_v15 }
 0x190   :  { %v1752_v29 = vmul.f32 %v1435_v49, %v4441_v22  ;;  %2534 = vpow2.f32 %v2291_v7  ;;  %v4780_v31 = vadd.f32 %v4438_v53, %v440_v5  ;;  %2093 = vst.msk [vmem:[%s5196_s4 + $0x8] sm:$0xff] %vm1771_vm8, %v1903_v44  ;;  %v2292_v60 = vmul.f32 -1.442695, %v4755_v47 }
 0x191   :  { %v2525_v20 = vpop.eup %2524  ;;  %v965_v27 = vsel %vm4749_vm15, %v2521_v40, %v961_v6  ;;  %vm1202_vm1 = vweird.f32 %v4740_v15  ;;  %v1208_v18 = vand.u32 2147483648, %v4740_v15  ;;  %vm4806_vm2 = vcmp.eq.f32.partialorder %v1206_v34, 8.507059e+37  ;;  %2094 = vst.msk [vmem:[%s5196_s4 + $0x10] sm:$0xff] %vm1771_vm8, %v1905_v0 }
 0x192   :  { %v2527_v22 = vpop.eup %2526  ;;  %1817 = vst.msk [vmem:[%s5195_s3 + $0x168] sm:$0xff] %vm1771_vm8, %v1752_v29  ;;  %v970_v30 = vsel %vm967_vm0, %v969_v24, %v965_v27  ;;  %v4790_v26 = vadd.f32 1.0, %v2525_v20  ;;  %1990 = vrot.lane.b32.xlu0 %v1752_v29, %s2556_s10  ;;  %v2276_v61 = vmul.f32 -1.442695, %v4780_v31 }
 0x193   :  { %v2529_v53 = vpop.eup %2528  ;;  %v1721_v38 = vmul.f32 %v970_v30, %v4456_v41  ;;  %v4795_v19 = vadd.f32 1.0, %v2527_v22  ;;  %v1941_v57 = vpop.permute.xlu2 %1940  ;;  %v1209_v39 = vor.u32 1.1754944e-38, %v1208_v18 }
 0x194   :  { %v2531_v8 = vpop.eup %2530  ;;  %2536 = vrcp.f32 %v4790_v26  ;;  %v1446_v35 = vand.u32 2147483647, %v4790_v26  ;;  %v1448_v32 = vand.u32 2147483648, %v4790_v26  ;;  %2112 = vst.msk [vmem:[%s5196_s4 + $0xa0] sm:$0xff] %vm1771_vm8, %v1941_v57  ;;  %v4819_v55 = vadd.f32 1.0, %v2529_v53 }
 0x195   :  { %v2533_v48 = vpop.eup %2532  ;;  %1786 = vst.msk [vmem:[%s5195_s3 + $0x70] sm:$0xff] %vm1771_vm8, %v1721_v38  ;;  %v1198_v36 = vmul.f32 %v2531_v8, %v4740_v15  ;;  %2538 = vrcp.f32 %v4795_v19  ;;  %v1671_v37 = vand.u32 2147483647, %v4795_v19  ;;  %v1673_v33 = vand.u32 2147483648, %v4795_v19 }
 0x196   :  { %v2535_v16 = vpop.eup %2534  ;;  %2540 = vpow2.f32 %v2292_v60  ;;  %vm1203_vm4 = vweird.f32 %v2531_v8  ;;  %v4821_v40 = vadd.f32 1.0, %v2533_v48  ;;  %v1967_v10 = vpop.permute.xlu0 %1966  ;;  %vm1442_vm5 = vweird.f32 %v4790_v26 }
 0x197   :  { %v1199_v62 = vsub.f32 1.0, %v1198_v36  ;;  %1928 = vrot.lane.b32.xlu2 %v1721_v38, %s2556_s10  ;;  %vm1667_vm3 = vweird.f32 %v4795_v19  ;;  %2542 = vpow2.f32 %v2276_v61  ;;  %2125 = vst.msk [vmem:[%s5196_s4 + $0x108] sm:$0xff] %vm1771_vm8, %v1967_v10  ;;  %vm4834_vm7 = vcmp.eq.f32.partialorder %v1446_v35, 8.507059e+37  ;;  %vm4844_vm6 = vmor %vm1202_vm1, %vm1203_vm4  ;;  %v1969_v25 = vpop.permute.xlu1 %1968 }
 0x198   :  { %2544 = vrcp.f32 %v4819_v55  ;;  %v4839_v45 = vadd.f32 1.0, %v2535_v16  ;;  %v1449_v58 = vor.u32 1.1754944e-38, %v1448_v32  ;;  %vm4848_vm9 = vcmp.eq.f32.partialorder %v1671_v37, 8.507059e+37  ;;  %2126 = vst.msk [vmem:[%s5196_s4 + $0x110] sm:$0xff] %vm1771_vm8, %v1969_v25 }
 0x199   :  { %v1200_v63 = vmul.f32 %v2531_v8, %v1199_v62  ;;  %v1674_v3 = vor.u32 1.1754944e-38, %v1673_v33  ;;  %2546 = vrcp.f32 %v4821_v40  ;;  %v981_v7 = vand.u32 2147483647, %v4819_v55 }
 0x19a   :  { %v2537_v13 = vpop.eup %2536  ;;  %v983_v59 = vand.u32 2147483648, %v4819_v55  ;;  %vm977_vm13 = vweird.f32 %v4819_v55  ;;  %vm1217_vm10 = vweird.f32 %v4821_v40  ;;  %v1223_v54 = vand.u32 2147483648, %v4821_v40 }
 0x19b   :  { %v2539_v46 = vpop.eup %2538  ;;  %v1201_v17 = vadd.f32 %v2531_v8, %v1200_v63  ;;  %v1438_v21 = vmul.f32 %v2537_v13, %v4790_v26  ;;  %vm1443_vm11 = vweird.f32 %v2537_v13  ;;  %2548 = vrcp.f32 %v4839_v45  ;;  %v1911_v23 = vpop.permute.xlu2 %1910 }
 0x19c   :  { %v2541_v52 = vpop.eup %2540  ;;  %v1663_v2 = vmul.f32 %v2539_v46, %v4795_v19  ;;  %vm1668_vm12 = vweird.f32 %v2539_v46  ;;  %v1221_v5 = vand.u32 2147483647, %v4821_v40  ;;  %2097 = vst.msk [vmem:[%s5196_s4 + $0x28] sm:$0xff] %vm1771_vm8, %v1911_v23  ;;  %vm4871_vm14 = vcmp.eq.f32.partialorder %v981_v7, 8.507059e+37  ;;  %vm4882_vm15 = vmor %vm1442_vm5, %vm1443_vm11 }
 0x19d   :  { %v1205_v15 = vsel %vm4844_vm6, %v2531_v8, %v1201_v17  ;;  %v1439_v56 = vsub.f32 1.0, %v1438_v21  ;;  %v2543_v43 = vpop.eup %2542  ;;  %v984_v20 = vor.u32 1.1754944e-38, %v983_v59  ;;  %vm1682_vm0 = vweird.f32 %v4839_v45  ;;  %vm4900_vm1 = vmor %vm1667_vm3, %vm1668_vm12 }
 0x19e   :  { %v1210_v50 = vsel %vm4806_vm2, %v1209_v39, %v1205_v15  ;;  %v1664_v24 = vsub.f32 1.0, %v1663_v2  ;;  %v2545_v49 = vpop.eup %2544  ;;  %v1937_v27 = vpop.permute.xlu0 %1936  ;;  %v1686_v60 = vand.u32 2147483647, %v4839_v45  ;;  %v1224_v8 = vor.u32 1.1754944e-38, %v1223_v54 }
 0x19f   :  { %v1737_v6 = vmul.f32 %v1210_v50, %v4491_v12  ;;  %v1440_v44 = vmul.f32 %v2537_v13, %v1439_v56  ;;  %v2547_v34 = vpop.eup %2546  ;;  %v973_v30 = vmul.f32 %v2545_v49, %v4819_v55  ;;  %2110 = vst.msk [vmem:[%s5196_s4 + $0x90] sm:$0xff] %vm1771_vm8, %v1937_v27  ;;  %v1688_v18 = vand.u32 2147483648, %v4839_v45  ;;  %v1907_v4 = vpop.permute.xlu1 %1906 }
 0x1a0   :  { %v1665_v12 = vmul.f32 %v2539_v46, %v1664_v24  ;;  %v1213_v38 = vmul.f32 %v2547_v34, %v4821_v40  ;;  %vm978_vm2 = vweird.f32 %v2545_v49  ;;  %v4907_v36 = vadd.f32 1.0, %v2541_v52  ;;  %2095 = vst.msk [vmem:[%s5196_s4 + $0x18] sm:$0xff] %vm1771_vm8, %v1907_v4 }
 0x1a1   :  { %1802 = vst.msk [vmem:[%s5195_s3 + $0xf0] sm:$0xff] %vm1771_vm8, %v1737_v6  ;;  %v1441_v26 = vadd.f32 %v2537_v13, %v1440_v44  ;;  %1960 = vrot.lane.b32.xlu0 %v1737_v6, %s2556_s10  ;;  %v974_v48 = vsub.f32 1.0, %v973_v30  ;;  %v2549_v41 = vpop.eup %2548  ;;  %vm1218_vm4 = vweird.f32 %v2547_v34  ;;  %v4911_v57 = vadd.f32 1.0, %v2543_v43  ;;  %vm4923_vm5 = vmor %vm977_vm13, %vm978_vm2 }
 0x1a2   :  { %v1666_v61 = vadd.f32 %v2539_v46, %v1665_v12  ;;  %v1214_v35 = vsub.f32 1.0, %v1213_v38  ;;  %v1678_v37 = vmul.f32 %v2549_v41, %v4839_v45  ;;  %vm1683_vm3 = vweird.f32 %v2549_v41 }
 0x1a3   :  { %v1445_v19 = vsel %vm4882_vm15, %v2537_v13, %v1441_v26  ;;  %v975_v32 = vmul.f32 %v2545_v49, %v974_v48  ;;  %v2007_v63 = vpop.permute.xlu2 %2006  ;;  %2550 = vrcp.f32 %v4907_v36  ;;  %vm1222_vm6 = vcmp.eq.f32.partialorder %v1221_v5, 8.507059e+37 }
 0x1a4   :  { %v1450_v0 = vsel %vm4834_vm7, %v1449_v58, %v1445_v19  ;;  %v1670_v16 = vsel %vm4900_vm1, %v2539_v46, %v1666_v61  ;;  %v1215_v39 = vmul.f32 %v2547_v34, %v1214_v35  ;;  %vm4933_vm7 = vmor %vm1217_vm10, %vm1218_vm4  ;;  %v1679_v55 = vsub.f32 1.0, %v1678_v37  ;;  %2145 = vst.msk [vmem:[%s5196_s4 + $0x1a8] sm:$0xff] %vm1771_vm8, %v2007_v63 }
 0x1a5   :  { %v1753_v33 = vmul.f32 %v1450_v0, %v4685_v42  ;;  %v1675_v62 = vsel %vm4848_vm9, %v1674_v3, %v1670_v16  ;;  %v976_v11 = vadd.f32 %v2545_v49, %v975_v32  ;;  %2552 = vrcp.f32 %v4911_v57  ;;  %vm1684_vm9 = vmor %vm1682_vm0, %vm1683_vm3 }
 0x1a6   :  { %v4928_v13 = vmul.f32 %v1675_v62, %v4689_v1  ;;  %v1216_v1 = vadd.f32 %v2547_v34, %v1215_v39  ;;  %v2003_v40 = vpop.permute.xlu0 %2002  ;;  %v1680_v9 = vmul.f32 %v2549_v41, %v1679_v55  ;;  %v1689_v17 = vor.u32 1.1754944e-38, %v1688_v18 }
 0x1a7   :  { %1818 = vst.msk [vmem:[%s5195_s3 + $0x170] sm:$0xff] %vm1771_vm8, %v1753_v33  ;;  %1992 = vrot.lane.b32.xlu1 %v1753_v33, %s2556_s10  ;;  %v980_v58 = vsel %vm4923_vm5, %v2545_v49, %v976_v11  ;;  %vm1687_vm11 = vcmp.eq.f32.partialorder %v1686_v60, 8.507059e+37  ;;  %v1939_v54 = vpop.permute.xlu1 %1938  ;;  %vm1697_vm13 = vweird.f32 %v4907_v36  ;;  %v1703_v25 = vand.u32 2147483648, %v4907_v36 }
 0x1a8   :  { %1833 = vst.msk [vmem:[%s5195_s3 + $0x1e8] sm:$0xff] %vm1771_vm8, %v4928_v13  ;;  %v985_v3 = vsel %vm4871_vm14, %v984_v20, %v980_v58  ;;  %v1220_v46 = vsel %vm4933_vm7, %v2547_v34, %v1216_v1  ;;  %v1681_v59 = vadd.f32 %v2549_v41, %v1680_v9  ;;  %v1701_v50 = vand.u32 2147483647, %v4907_v36 }
 0x1a9   :  { %v1722_v21 = vmul.f32 %v985_v3, %v4700_v51  ;;  %v1225_v7 = vsel %vm1222_vm6, %v1224_v8, %v1220_v46  ;;  %2143 = vst.msk [vmem:[%s5196_s4 + $0x198] sm:$0xff] %vm1771_vm8, %v2003_v40  ;;  %v2551_v45 = vpop.eup %2550  ;;  %vm1457_vm12 = vweird.f32 %v4911_v57  ;;  %v1463_v5 = vand.u32 2147483648, %v4911_v57 }
 0x1aa   :  { %v1738_v52 = vmul.f32 %v1225_v7, %v4703_v28  ;;  %v1685_v2 = vsel %vm1684_vm9, %v2549_v41, %v1681_v59  ;;  %v1693_v15 = vmul.f32 %v2551_v45, %v4907_v36  ;;  %vm1698_vm10 = vweird.f32 %v2551_v45  ;;  %2111 = vst.msk [vmem:[%s5196_s4 + $0x98] sm:$0xff] %vm1771_vm8, %v1939_v54 }
 0x1ab   :  { %1787 = vst.msk [vmem:[%s5195_s3 + $0x78] sm:$0xff] %vm1771_vm8, %v1722_v21  ;;  %1930 = vrot.lane.b32.xlu0 %v1722_v21, %s2556_s10  ;;  %v1690_v51 = vsel %vm1687_vm11, %v1689_v17, %v1685_v2  ;;  %v1977_v56 = vpop.permute.xlu2 %1976  ;;  %v2553_v28 = vpop.eup %2552  ;;  %v1461_v44 = vand.u32 2147483647, %v4911_v57  ;;  %vm1699_vm15 = vmor %vm1697_vm13, %vm1698_vm10  ;;  %v1704_v29 = vor.u32 1.1754944e-38, %v1703_v25  ;;  %vm1702_vm0 = vcmp.eq.f32.partialorder %v1701_v50, 8.507059e+37 }
 0x1ac   :  { %1803 = vst.msk [vmem:[%s5195_s3 + $0xf8] sm:$0xff] %vm1771_vm8, %v1738_v52  ;;  %v1769_v23 = vmul.f32 %v1690_v51, %v4706_v14  ;;  %v1694_v43 = vsub.f32 1.0, %v1693_v15  ;;  %v1453_v24 = vmul.f32 %v2553_v28, %v4911_v57  ;;  %vm1458_vm14 = vweird.f32 %v2553_v28 }
 0x1ad   :  { %2130 = vst.msk [vmem:[%s5196_s4 + $0x130] sm:$0xff] %vm1771_vm8, %v1977_v56  ;;  %vm1459_vm1 = vmor %vm1457_vm12, %vm1458_vm14  ;;  %v1464_v34 = vor.u32 1.1754944e-38, %v1463_v5  ;;  %vm1462_vm2 = vcmp.eq.f32.partialorder %v1461_v44, 8.507059e+37 }
 0x1ae   :  { %v1973_v14 = vpop.permute.xlu0 %1972  ;;  %1834 = vst.msk [vmem:[%s5195_s3 + $0x1f0] sm:$0xff] %vm1771_vm8, %v1769_v23  ;;  %v1695_v49 = vmul.f32 %v2551_v45, %v1694_v43  ;;  %v1454_v6 = vsub.f32 1.0, %v1453_v24 }
 0x1af   :  { %1962 = vrot.lane.b32.xlu1 %v1738_v52, %s2556_s10  ;;  %2128 = vst.msk [vmem:[%s5196_s4 + $0x120] sm:$0xff] %vm1771_vm8, %v1973_v14  ;;  %v2005_v60 = vpop.permute.xlu1 %2004 }
 0x1b0   :  { %v1696_v20 = vadd.f32 %v2551_v45, %v1695_v49  ;;  %v1455_v27 = vmul.f32 %v2553_v28, %v1454_v6  ;;  %2144 = vst.msk [vmem:[%s5196_s4 + $0x1a0] sm:$0xff] %vm1771_vm8, %v2005_v60 }
 0x1b2   :  { %v1700_v22 = vsel %vm1699_vm15, %v2551_v45, %v1696_v20  ;;  %v1456_v12 = vadd.f32 %v2553_v28, %v1455_v27 }
 0x1b3   :  { %v1947_v30 = vpop.permute.xlu2 %1946  ;;  %v1705_v26 = vsel %vm1702_vm0, %v1704_v29, %v1700_v22 }
 0x1b4   :  { %2115 = vst.msk [vmem:[%s5196_s4 + $0xb8] sm:$0xff] %vm1771_vm8, %v1947_v30  ;;  %v1770_v53 = vmul.f32 %v1705_v26, %v4755_v47  ;;  %v1460_v38 = vsel %vm1459_vm1, %v2553_v28, %v1456_v12 }
 0x1b5   :  { %v1465_v18 = vsel %vm1462_vm2, %v1464_v34, %v1460_v38 }
 0x1b6   :  { %v1943_v8 = vpop.permute.xlu0 %1942  ;;  %1835 = vst.msk [vmem:[%s5195_s3 + $0x1f8] sm:$0xff] %vm1771_vm8, %v1770_v53  ;;  %v1754_v47 = vmul.f32 %v1465_v18, %v4780_v31  ;;  %2026 = vrot.lane.b32.xlu0 %v1770_v53, %s2556_s10 }
 0x1b7   :  { %2022 = vrot.lane.b32.xlu1 %v4928_v13, %s2556_s10  ;;  %2113 = vst.msk [vmem:[%s5196_s4 + $0xa8] sm:$0xff] %vm1771_vm8, %v1943_v8  ;;  %v1975_v48 = vpop.permute.xlu1 %1974 }
 0x1b8   :  { %1819 = vst.msk [vmem:[%s5195_s3 + $0x178] sm:$0xff] %vm1771_vm8, %v1754_v47  ;;  %1994 = vrot.lane.b32.xlu2 %v1754_v47, %s2556_s10 }
 0x1b9   :  { %2129 = vst.msk [vmem:[%s5196_s4 + $0x128] sm:$0xff] %vm1771_vm8, %v1975_v48 }
 0x1bb   :  { %v1917_v61 = vpop.permute.xlu2 %1916 }
 0x1bc   :  { %2100 = vst.msk [vmem:[%s5196_s4 + $0x40] sm:$0xff] %vm1771_vm8, %v1917_v61 }
 0x1be   :  { %v1913_v31 = vpop.permute.xlu0 %1912 }
 0x1bf   :  { %2098 = vst.msk [vmem:[%s5196_s4 + $0x30] sm:$0xff] %vm1771_vm8, %v1913_v31  ;;  %v1945_v41 = vpop.permute.xlu1 %1944 }
 0x1c0   :  { %2024 = vrot.lane.b32.xlu2 %v1769_v23, %s2556_s10  ;;  %2114 = vst.msk [vmem:[%s5196_s4 + $0xb0] sm:$0xff] %vm1771_vm8, %v1945_v41 }
 0x1c3   :  { %v2013_v36 = vpop.permute.xlu2 %2012 }
 0x1c4   :  { %2148 = vst.msk [vmem:[%s5196_s4 + $0x1c0] sm:$0xff] %vm1771_vm8, %v2013_v36 }
 0x1c6   :  { %v2009_v19 = vpop.permute.xlu0 %2008 }
 0x1c7   :  { %2146 = vst.msk [vmem:[%s5196_s4 + $0x1b0] sm:$0xff] %vm1771_vm8, %v2009_v19  ;;  %v1915_v57 = vpop.permute.xlu1 %1914 }
 0x1c8   :  { %2099 = vst.msk [vmem:[%s5196_s4 + $0x38] sm:$0xff] %vm1771_vm8, %v1915_v57 }
 0x1cb   :  { %v1983_v35 = vpop.permute.xlu2 %1982 }
 0x1cc   :  { %2133 = vst.msk [vmem:[%s5196_s4 + $0x148] sm:$0xff] %vm1771_vm8, %v1983_v35 }
 0x1ce   :  { %v1979_v0 = vpop.permute.xlu0 %1978 }
 0x1cf   :  { %2131 = vst.msk [vmem:[%s5196_s4 + $0x138] sm:$0xff] %vm1771_vm8, %v1979_v0  ;;  %v2011_v32 = vpop.permute.xlu1 %2010 }
 0x1d0   :  { %2147 = vst.msk [vmem:[%s5196_s4 + $0x1b8] sm:$0xff] %vm1771_vm8, %v2011_v32 }
 0x1d3   :  { %v1953_v16 = vpop.permute.xlu2 %1952 }
 0x1d4   :  { %2118 = vst.msk [vmem:[%s5196_s4 + $0xd0] sm:$0xff] %vm1771_vm8, %v1953_v16 }
 0x1d6   :  { %v1949_v37 = vpop.permute.xlu0 %1948 }
 0x1d7   :  { %2116 = vst.msk [vmem:[%s5196_s4 + $0xc0] sm:$0xff] %vm1771_vm8, %v1949_v37  ;;  %v1981_v62 = vpop.permute.xlu1 %1980 }
 0x1d8   :  { %2132 = vst.msk [vmem:[%s5196_s4 + $0x140] sm:$0xff] %vm1771_vm8, %v1981_v62 }
 0x1db   :  { %v1923_v33 = vpop.permute.xlu2 %1922 }
 0x1dc   :  { %2103 = vst.msk [vmem:[%s5196_s4 + $0x58] sm:$0xff] %vm1771_vm8, %v1923_v33 }
 0x1de   :  { %v1919_v10 = vpop.permute.xlu0 %1918 }
 0x1df   :  { %2101 = vst.msk [vmem:[%s5196_s4 + $0x48] sm:$0xff] %vm1771_vm8, %v1919_v10  ;;  %v1951_v63 = vpop.permute.xlu1 %1950 }
 0x1e0   :  { %2117 = vst.msk [vmem:[%s5196_s4 + $0xc8] sm:$0xff] %vm1771_vm8, %v1951_v63 }
 0x1e3   :  { %v2019_v39 = vpop.permute.xlu2 %2018 }
 0x1e4   :  { %2151 = vst.msk [vmem:[%s5196_s4 + $0x1d8] sm:$0xff] %vm1771_vm8, %v2019_v39 }
 0x1e6   :  { %v2015_v4 = vpop.permute.xlu0 %2014 }
 0x1e7   :  { %2149 = vst.msk [vmem:[%s5196_s4 + $0x1c8] sm:$0xff] %vm1771_vm8, %v2015_v4  ;;  %v1921_v11 = vpop.permute.xlu1 %1920 }
 0x1e8   :  { %2102 = vst.msk [vmem:[%s5196_s4 + $0x50] sm:$0xff] %vm1771_vm8, %v1921_v11 }
 0x1eb   :  { %v1989_v13 = vpop.permute.xlu2 %1988 }
 0x1ec   :  { %2136 = vst.msk [vmem:[%s5196_s4 + $0x160] sm:$0xff] %vm1771_vm8, %v1989_v13 }
 0x1ee   :  { %v1985_v42 = vpop.permute.xlu0 %1984 }
 0x1ef   :  { %2134 = vst.msk [vmem:[%s5196_s4 + $0x150] sm:$0xff] %vm1771_vm8, %v1985_v42  ;;  %v2017_v1 = vpop.permute.xlu1 %2016 }
 0x1f0   :  { %2150 = vst.msk [vmem:[%s5196_s4 + $0x1d0] sm:$0xff] %vm1771_vm8, %v2017_v1 }
 0x1f3   :  { %v1959_v55 = vpop.permute.xlu2 %1958 }
 0x1f4   :  { %2121 = vst.msk [vmem:[%s5196_s4 + $0xe8] sm:$0xff] %vm1771_vm8, %v1959_v55 }
 0x1f6   :  { %v1955_v40 = vpop.permute.xlu0 %1954 }
 0x1f7   :  { %2119 = vst.msk [vmem:[%s5196_s4 + $0xd8] sm:$0xff] %vm1771_vm8, %v1955_v40  ;;  %v1987_v9 = vpop.permute.xlu1 %1986 }
 0x1f8   :  { %2135 = vst.msk [vmem:[%s5196_s4 + $0x158] sm:$0xff] %vm1771_vm8, %v1987_v9 }
 0x1fb   :  { %v1929_v58 = vpop.permute.xlu2 %1928 }
 0x1fc   :  { %2106 = vst.msk [vmem:[%s5196_s4 + $0x70] sm:$0xff] %vm1771_vm8, %v1929_v58 }
 0x1fe   :  { %v1925_v3 = vpop.permute.xlu0 %1924 }
 0x1ff   :  { %2104 = vst.msk [vmem:[%s5196_s4 + $0x60] sm:$0xff] %vm1771_vm8, %v1925_v3  ;;  %v1957_v46 = vpop.permute.xlu1 %1956 }
 0x200   :  { %2120 = vst.msk [vmem:[%s5196_s4 + $0xe0] sm:$0xff] %vm1771_vm8, %v1957_v46 }
 0x206   :  { %v2021_v17 = vpop.permute.xlu0 %2020 }
 0x207   :  { %2152 = vst.msk [vmem:[%s5196_s4 + $0x1e0] sm:$0xff] %vm1771_vm8, %v2021_v17  ;;  %v1927_v21 = vpop.permute.xlu1 %1926 }
 0x208   :  { %2105 = vst.msk [vmem:[%s5196_s4 + $0x68] sm:$0xff] %vm1771_vm8, %v1927_v21 }
 0x20e   :  { %v1991_v7 = vpop.permute.xlu0 %1990 }
 0x20f   :  { %2137 = vst.msk [vmem:[%s5196_s4 + $0x168] sm:$0xff] %vm1771_vm8, %v1991_v7 }
 0x212   :  { %v1995_v59 = vpop.permute.xlu2 %1994 }
 0x213   :  { %2139 = vst.msk [vmem:[%s5196_s4 + $0x178] sm:$0xff] %vm1771_vm8, %v1995_v59 }
 0x216   :  { %v1961_v52 = vpop.permute.xlu0 %1960 }
 0x217   :  { %2122 = vst.msk [vmem:[%s5196_s4 + $0xf0] sm:$0xff] %vm1771_vm8, %v1961_v52 }
 0x219   :  { %v1993_v45 = vpop.permute.xlu1 %1992 }
 0x21a   :  { %2138 = vst.msk [vmem:[%s5196_s4 + $0x170] sm:$0xff] %vm1771_vm8, %v1993_v45  ;;  %v2025_v2 = vpop.permute.xlu2 %2024 }
 0x21b   :  { %2154 = vst.msk [vmem:[%s5196_s4 + $0x1f0] sm:$0xff] %vm1771_vm8, %v2025_v2 }
 0x21e   :  { %v1931_v51 = vpop.permute.xlu0 %1930 }
 0x21f   :  { %2107 = vst.msk [vmem:[%s5196_s4 + $0x78] sm:$0xff] %vm1771_vm8, %v1931_v51 }
 0x221   :  { %v1963_v15 = vpop.permute.xlu1 %1962 }
 0x222   :  { %2123 = vst.msk [vmem:[%s5196_s4 + $0xf8] sm:$0xff] %vm1771_vm8, %v1963_v15 }
 0x228   :  { %v2027_v54 = vpop.permute.xlu0 %2026 }
 0x229   :  { %v2023_v56 = vpop.permute.xlu1 %2022  ;;  %2155 = vst.msk [vmem:[%s5196_s4 + $0x1f8] sm:$0xff] %vm1771_vm8, %v2027_v54 }
 0x22a   :  { %2153 = vst.msk [vmem:[%s5196_s4 + $0x1e8] sm:$0xff] %vm1771_vm8, %v2023_v56 }

</bundles_post_ra>
